<compile_context>
chip_gen: v5e
topology: v5e:2x2
jax: 0.10.0
libtpu: 0.0.40
codegen_flags: <defaults>
</compile_context>

<pallas_src>
import jax
import jax.numpy as jnp
from jax import lax
from jax.experimental import pallas as pl
from jax.experimental.pallas import tpu as pltpu

# ----------------------------- model config ---------------------------------
VOCAB = 64
MAX_POS = 16
TYPE_VOCAB = 2
HIDDEN = 32
NUM_LAYERS = 2
NUM_HEADS = 4
HEAD_DIM = HIDDEN // NUM_HEADS
INTERMEDIATE = 64
NUM_LABELS = 2
LN_EPS = 1e-12


# ----------------------------- fused Pallas kernel --------------------------
def _bert_fused_kernel(ids_ref, mask_ref, pos_type_ref, word_emb_ref,
                       emb_ln_g_ref, emb_ln_b_ref,
                       w_qkv_ref, b_qkv_ref, w_ao_ref, b_ao_ref,
                       ln1_g_ref, ln1_b_ref, w_i_ref, b_i_ref,
                       w_o_ref, b_o_ref, ln2_g_ref, ln2_b_ref,
                       pool_w_ref, pool_b_ref, cls_w_ref, cls_b_ref,
                       o_ref, ctx_ref):
    B, S = mask_ref.shape
    BS = B * S
    V, H = word_emb_ref.shape
    scale = 1.0 / float(HEAD_DIM) ** 0.5

    def ln(h, g, beta):                                    # residual already added
        mu = jnp.mean(h, axis=-1, keepdims=True)
        hc = h - mu
        var = jnp.mean(hc * hc, axis=-1, keepdims=True)
        return hc * lax.rsqrt(var + LN_EPS) * g + beta

    def mm(x, w, b):
        return jnp.dot(x, w, preferred_element_type=jnp.float32) + b

    # --- embeddings: one-hot gather on the MXU + pos/type add + LayerNorm ---
    ids = ids_ref[...]                                                   # (BS, 1) i32
    one_hot = (lax.broadcasted_iota(jnp.int32, (BS, V), 1) == ids).astype(jnp.float32)
    x = jnp.dot(one_hot, word_emb_ref[...], preferred_element_type=jnp.float32)
    x = ln(x + pos_type_ref[...], emb_ln_g_ref[...], emb_ln_b_ref[...])  # dropout: identity

    # additive attention-mask bias, BERT convention: (1 - mask) * -10000
    bias = (1.0 - mask_ref[...].astype(jnp.float32)) * -10000.0          # (B, S)

    # --- encoder layers (static unroll, everything VMEM-resident) ---
    for l in range(NUM_LAYERS):
        qkv = mm(x, w_qkv_ref[l], b_qkv_ref[l])                          # (BS, 3H)

        # per-(batch, head) attention with static slices; result scattered into
        # ctx_ref so head merge needs no transpose/reshape through HBM.
        for b in range(B):
            r0 = b * S
            bias_b = bias[b:b + 1, :]                                    # (1, S)
            for h in range(NUM_HEADS):
                c0 = h * HEAD_DIM
                q_bh = qkv[r0:r0 + S, c0:c0 + HEAD_DIM]
                k_bh = qkv[r0:r0 + S, H + c0:H + c0 + HEAD_DIM]
                v_bh = qkv[r0:r0 + S, 2 * H + c0:2 * H + c0 + HEAD_DIM]
                s = lax.dot_general(q_bh, k_bh, (((1,), (1,)), ((), ())),
                                    preferred_element_type=jnp.float32) * scale
                s = s + bias_b                                           # bcast over queries
                m = jnp.max(s, axis=-1, keepdims=True)
                p = jnp.exp(s - m)
                p = p * pl.reciprocal(jnp.sum(p, axis=-1, keepdims=True), approx=True)
                ctx_ref[r0:r0 + S, c0:c0 + HEAD_DIM] = jnp.dot(
                    p, v_bh, preferred_element_type=jnp.float32)
        ctx = ctx_ref[...]                                               # (BS, H)

        attn_out = mm(ctx, w_ao_ref[l], b_ao_ref[l])                     # dropout: identity
        x = ln(attn_out + x, ln1_g_ref[l], ln1_b_ref[l])                 # fused residual+LN

        inter = mm(x, w_i_ref[l], b_i_ref[l])
        # tanh-approx GELU ("gelu_new")
        inter = 0.5 * inter * (1.0 + jnp.tanh(
            0.7978845608028654 * (inter + 0.044715 * inter * inter * inter)))
        out = mm(inter, w_o_ref[l], b_o_ref[l])                          # dropout: identity
        x = ln(out + x, ln2_g_ref[l], ln2_b_ref[l])                      # fused residual+LN

    # --- pooler (tanh on [CLS]) + dropout (identity) + classifier head ---
    cls_tok = jnp.concatenate([x[b * S:b * S + 1, :] for b in range(B)], axis=0)  # (B, H)
    pooled = jnp.tanh(mm(cls_tok, pool_w_ref[...], pool_b_ref[...]))
    logits = mm(pooled, cls_w_ref[...], cls_b_ref[...])
    o_ref[...] = logits.astype(o_ref.dtype)


# ----------------------------- parameter init -------------------------------
def init_params(key):
    def norm(k, shape):
        return 0.02 * jax.random.normal(k, shape, jnp.float32)

    H, I, L = HIDDEN, INTERMEDIATE, NUM_LAYERS
    keys = iter(jax.random.split(key, 5 + L * 6))
    p = {
        "word_emb": norm(next(keys), (VOCAB, H)),
        "pos_emb": norm(next(keys), (MAX_POS, H)),
        "type_emb": norm(next(keys), (TYPE_VOCAB, H)),
        "emb_ln_g": jnp.ones((1, H), jnp.float32),
        "emb_ln_b": jnp.zeros((1, H), jnp.float32),
        "pool_w": norm(next(keys), (H, H)),
        "pool_b": jnp.zeros((1, H), jnp.float32),
        "cls_w": norm(next(keys), (H, NUM_LABELS)),
        "cls_b": jnp.zeros((1, NUM_LABELS), jnp.float32),
    }
    w_qkv, w_ao, w_i, w_o = [], [], [], []
    for _ in range(L):
        qw = norm(next(keys), (H, H))
        kw = norm(next(keys), (H, H))
        vw = norm(next(keys), (H, H))
        w_qkv.append(jnp.concatenate([qw, kw, vw], axis=1))              # (H, 3H)
        w_ao.append(norm(next(keys), (H, H)))
        w_i.append(norm(next(keys), (H, I)))
        w_o.append(norm(next(keys), (I, H)))
    p.update({
        "w_qkv": jnp.stack(w_qkv), "b_qkv": jnp.zeros((L, 1, 3 * H), jnp.float32),
        "w_ao": jnp.stack(w_ao),   "b_ao": jnp.zeros((L, 1, H), jnp.float32),
        "ln1_g": jnp.ones((L, 1, H), jnp.float32),
        "ln1_b": jnp.zeros((L, 1, H), jnp.float32),
        "w_i": jnp.stack(w_i),     "b_i": jnp.zeros((L, 1, I), jnp.float32),
        "w_o": jnp.stack(w_o),     "b_o": jnp.zeros((L, 1, H), jnp.float32),
        "ln2_g": jnp.ones((L, 1, H), jnp.float32),
        "ln2_b": jnp.zeros((L, 1, H), jnp.float32),
    })
    return p


# ----------------------------- forward pass ----------------------------------
@jax.jit
def bert_classifier_forward(params, input_ids, attention_mask):
    B, S = input_ids.shape
    ids_flat = input_ids.reshape(B * S, 1).astype(jnp.int32)
    mask = attention_mask.astype(jnp.int32)
    # position + token-type embedding contribution (parameter-only, tiny, done once)
    pos_type = jnp.tile(params["pos_emb"][:S] + params["type_emb"][0][None, :], (B, 1))

    vmem = pl.BlockSpec(memory_space=pltpu.MemorySpace.VMEM)
    inputs = (ids_flat, mask, pos_type,
              params["word_emb"], params["emb_ln_g"], params["emb_ln_b"],
              params["w_qkv"], params["b_qkv"], params["w_ao"], params["b_ao"],
              params["ln1_g"], params["ln1_b"], params["w_i"], params["b_i"],
              params["w_o"], params["b_o"], params["ln2_g"], params["ln2_b"],
              params["pool_w"], params["pool_b"], params["cls_w"], params["cls_b"])
    return pl.pallas_call(
        _bert_fused_kernel,
        out_shape=jax.ShapeDtypeStruct((B, NUM_LABELS), jnp.float32),
        in_specs=[vmem] * len(inputs),
        out_specs=vmem,
        scratch_shapes=[pltpu.VMEM((B * S, HIDDEN), jnp.float32)],       # attention ctx
    )(*inputs)


# ----------------------------- main ------------------------------------------
if __name__ == "__main__":
    root = jax.random.PRNGKey(0)
    kp, kid = jax.random.split(root)

    params = init_params(kp)

    B, S = 2, 8
    input_ids = jax.random.randint(kid, (B, S), 0, VOCAB, dtype=jnp.int32)
    attention_mask = jnp.ones((B, S), jnp.int32).at[1, 6:].set(0)

    logits = bert_classifier_forward(params, input_ids, attention_mask)
    jax.block_until_ready(logits)
    assert logits.shape == (B, NUM_LABELS)
    print("KERNEL_OK")
</pallas_src>

<mosaic_0001>
module attributes {stable_mosaic.version = 11 : i64} {
  func.func @_bert_fused_kernel(%arg0: memref<16x1xi32, #tpu.memory_space<vmem>>, %arg1: memref<2x8xi32, #tpu.memory_space<vmem>>, %arg2: memref<16x32xf32, #tpu.memory_space<vmem>>, %arg3: memref<64x32xf32, #tpu.memory_space<vmem>>, %arg4: memref<1x32xf32, #tpu.memory_space<vmem>>, %arg5: memref<1x32xf32, #tpu.memory_space<vmem>>, %arg6: memref<2x32x96xf32, #tpu.memory_space<vmem>>, %arg7: memref<2x1x96xf32, #tpu.memory_space<vmem>>, %arg8: memref<2x32x32xf32, #tpu.memory_space<vmem>>, %arg9: memref<2x1x32xf32, #tpu.memory_space<vmem>>, %arg10: memref<2x1x32xf32, #tpu.memory_space<vmem>>, %arg11: memref<2x1x32xf32, #tpu.memory_space<vmem>>, %arg12: memref<2x32x64xf32, #tpu.memory_space<vmem>>, %arg13: memref<2x1x64xf32, #tpu.memory_space<vmem>>, %arg14: memref<2x64x32xf32, #tpu.memory_space<vmem>>, %arg15: memref<2x1x32xf32, #tpu.memory_space<vmem>>, %arg16: memref<2x1x32xf32, #tpu.memory_space<vmem>>, %arg17: memref<2x1x32xf32, #tpu.memory_space<vmem>>, %arg18: memref<32x32xf32, #tpu.memory_space<vmem>>, %arg19: memref<1x32xf32, #tpu.memory_space<vmem>>, %arg20: memref<32x2xf32, #tpu.memory_space<vmem>>, %arg21: memref<1x2xf32, #tpu.memory_space<vmem>>, %arg22: memref<2x2xf32, #tpu.memory_space<vmem>>, %arg23: memref<16x32xf32, #tpu.memory_space<vmem>>) attributes {dimension_semantics = [], scalar_prefetch = 0 : i64, scratch_operands = 1 : i64, tpu.core_type = #tpu.core_type<tc>} {
    %c0 = arith.constant 0 : index
    %c0_0 = arith.constant 0 : index
    %0 = vector.load %arg0[%c0, %c0_0] : memref<16x1xi32, #tpu.memory_space<vmem>>, vector<16x1xi32>
    %1 = tpu.iota {dimensions = array<i32: 1>} : vector<16x64xi32>
    %2 = vector.broadcast %0 : vector<16x1xi32> to vector<16x64xi32>
    %3 = arith.cmpi eq, %1, %2 : vector<16x64xi32>
    %4 = arith.extui %3 : vector<16x64xi1> to vector<16x64xi32>
    %5 = arith.sitofp %4 : vector<16x64xi32> to vector<16x64xf32>
    %c0_1 = arith.constant 0 : index
    %c0_2 = arith.constant 0 : index
    %6 = vector.load %arg3[%c0_1, %c0_2] : memref<64x32xf32, #tpu.memory_space<vmem>>, vector<64x32xf32>
    %cst = arith.constant dense<0.000000e+00> : vector<16x32xf32>
    %7 = tpu.matmul %5, %6, %cst {dimension_numbers = #tpu.dot_dimension_numbers<[1], [0], [0], [1], [0, 0, 1, 1], [], []>} : vector<16x64xf32>, vector<64x32xf32>, vector<16x32xf32> -> vector<16x32xf32>
    %c0_3 = arith.constant 0 : index
    %c0_4 = arith.constant 0 : index
    %8 = vector.load %arg2[%c0_3, %c0_4] : memref<16x32xf32, #tpu.memory_space<vmem>>, vector<16x32xf32>
    %9 = arith.addf %7, %8 : vector<16x32xf32>
    %c0_5 = arith.constant 0 : index
    %c0_6 = arith.constant 0 : index
    %10 = vector.load %arg4[%c0_5, %c0_6] : memref<1x32xf32, #tpu.memory_space<vmem>>, vector<1x32xf32>
    %c0_7 = arith.constant 0 : index
    %c0_8 = arith.constant 0 : index
    %11 = vector.load %arg5[%c0_7, %c0_8] : memref<1x32xf32, #tpu.memory_space<vmem>>, vector<1x32xf32>
    %cst_9 = arith.constant dense<0.000000e+00> : vector<16xf32>
    %12 = vector.multi_reduction <add>, %9, %cst_9 [1] : vector<16x32xf32> to vector<16xf32>
    %13 = vector.shape_cast %12 : vector<16xf32> to vector<16x1xf32>
    %cst_10 = arith.constant 3.200000e+01 : f32
    %14 = vector.broadcast %cst_10 : f32 to vector<16x1xf32>
    %15 = arith.divf %13, %14 : vector<16x1xf32>
    %16 = vector.broadcast %15 : vector<16x1xf32> to vector<16x32xf32>
    %17 = arith.subf %9, %16 : vector<16x32xf32>
    %18 = arith.mulf %17, %17 : vector<16x32xf32>
    %cst_11 = arith.constant dense<0.000000e+00> : vector<16xf32>
    %19 = vector.multi_reduction <add>, %18, %cst_11 [1] : vector<16x32xf32> to vector<16xf32>
    %20 = vector.shape_cast %19 : vector<16xf32> to vector<16x1xf32>
    %cst_12 = arith.constant 3.200000e+01 : f32
    %21 = vector.broadcast %cst_12 : f32 to vector<16x1xf32>
    %22 = arith.divf %20, %21 : vector<16x1xf32>
    %cst_13 = arith.constant 9.99999996E-13 : f32
    %23 = vector.broadcast %cst_13 : f32 to vector<16x1xf32>
    %24 = arith.addf %22, %23 : vector<16x1xf32>
    %25 = math.rsqrt %24 : vector<16x1xf32>
    %26 = vector.broadcast %25 : vector<16x1xf32> to vector<16x32xf32>
    %27 = arith.mulf %17, %26 : vector<16x32xf32>
    %28 = vector.broadcast %10 : vector<1x32xf32> to vector<16x32xf32>
    %29 = arith.mulf %27, %28 : vector<16x32xf32>
    %30 = vector.broadcast %11 : vector<1x32xf32> to vector<16x32xf32>
    %31 = arith.addf %29, %30 : vector<16x32xf32>
    %c0_14 = arith.constant 0 : index
    %c0_15 = arith.constant 0 : index
    %32 = vector.load %arg1[%c0_14, %c0_15] : memref<2x8xi32, #tpu.memory_space<vmem>>, vector<2x8xi32>
    %33 = arith.sitofp %32 : vector<2x8xi32> to vector<2x8xf32>
    %cst_16 = arith.constant 1.000000e+00 : f32
    %34 = vector.broadcast %cst_16 : f32 to vector<2x8xf32>
    %35 = arith.subf %34, %33 : vector<2x8xf32>
    %cst_17 = arith.constant -1.000000e+04 : f32
    %36 = vector.broadcast %cst_17 : f32 to vector<2x8xf32>
    %37 = arith.mulf %35, %36 : vector<2x8xf32>
    %c0_18 = arith.constant 0 : index
    %c0_19 = arith.constant 0 : index
    %c0_20 = arith.constant 0 : index
    %38 = vector.load %arg6[%c0_18, %c0_19, %c0_20] : memref<2x32x96xf32, #tpu.memory_space<vmem>>, vector<1x32x96xf32>
    %39 = vector.shape_cast %38 : vector<1x32x96xf32> to vector<32x96xf32>
    %c0_21 = arith.constant 0 : index
    %c0_22 = arith.constant 0 : index
    %c0_23 = arith.constant 0 : index
    %40 = vector.load %arg7[%c0_21, %c0_22, %c0_23] : memref<2x1x96xf32, #tpu.memory_space<vmem>>, vector<1x1x96xf32>
    %41 = vector.shape_cast %40 : vector<1x1x96xf32> to vector<1x96xf32>
    %cst_24 = arith.constant dense<0.000000e+00> : vector<16x96xf32>
    %42 = tpu.matmul %31, %39, %cst_24 {dimension_numbers = #tpu.dot_dimension_numbers<[1], [0], [0], [1], [0, 0, 1, 1], [], []>} : vector<16x32xf32>, vector<32x96xf32>, vector<16x96xf32> -> vector<16x96xf32>
    %43 = vector.broadcast %41 : vector<1x96xf32> to vector<16x96xf32>
    %44 = arith.addf %42, %43 : vector<16x96xf32>
    %45 = vector.extract_strided_slice %37 {offsets = [0, 0], sizes = [1, 8], strides = [1, 1]} : vector<2x8xf32> to vector<1x8xf32>
    %46 = vector.extract_strided_slice %44 {offsets = [0, 0], sizes = [8, 8], strides = [1, 1]} : vector<16x96xf32> to vector<8x8xf32>
    %47 = vector.extract_strided_slice %44 {offsets = [0, 32], sizes = [8, 8], strides = [1, 1]} : vector<16x96xf32> to vector<8x8xf32>
    %48 = vector.extract_strided_slice %44 {offsets = [0, 64], sizes = [8, 8], strides = [1, 1]} : vector<16x96xf32> to vector<8x8xf32>
    %cst_25 = arith.constant dense<0.000000e+00> : vector<8x8xf32>
    %49 = tpu.matmul %46, %47, %cst_25 {dimension_numbers = #tpu.dot_dimension_numbers<[1], [1], [0], [0], [0, 0, 1, 0], [], []>} : vector<8x8xf32>, vector<8x8xf32>, vector<8x8xf32> -> vector<8x8xf32>
    %cst_26 = arith.constant 0.353553385 : f32
    %50 = vector.broadcast %cst_26 : f32 to vector<8x8xf32>
    %51 = arith.mulf %49, %50 : vector<8x8xf32>
    %52 = vector.broadcast %45 : vector<1x8xf32> to vector<8x8xf32>
    %53 = arith.addf %51, %52 : vector<8x8xf32>
    %cst_27 = arith.constant dense<0xFF800000> : vector<8xf32>
    %54 = vector.multi_reduction <maximumf>, %53, %cst_27 [1] : vector<8x8xf32> to vector<8xf32>
    %55 = vector.shape_cast %54 : vector<8xf32> to vector<8x1xf32>
    %56 = vector.broadcast %55 : vector<8x1xf32> to vector<8x8xf32>
    %57 = arith.subf %53, %56 : vector<8x8xf32>
    %58 = math.exp %57 : vector<8x8xf32>
    %cst_28 = arith.constant dense<0.000000e+00> : vector<8xf32>
    %59 = vector.multi_reduction <add>, %58, %cst_28 [1] : vector<8x8xf32> to vector<8xf32>
    %60 = vector.shape_cast %59 : vector<8xf32> to vector<8x1xf32>
    %61 = tpu.reciprocal %60 {approx = true} : vector<8x1xf32> -> vector<8x1xf32>
    %62 = vector.broadcast %61 : vector<8x1xf32> to vector<8x8xf32>
    %63 = arith.mulf %58, %62 : vector<8x8xf32>
    %cst_29 = arith.constant dense<0.000000e+00> : vector<8x8xf32>
    %64 = tpu.matmul %63, %48, %cst_29 {dimension_numbers = #tpu.dot_dimension_numbers<[1], [0], [0], [1], [0, 0, 1, 1], [], []>} : vector<8x8xf32>, vector<8x8xf32>, vector<8x8xf32> -> vector<8x8xf32>
    %c0_30 = arith.constant 0 : index
    %c0_31 = arith.constant 0 : index
    %65 = vector.load %arg23[%c0_30, %c0_31] : memref<16x32xf32, #tpu.memory_space<vmem>>, vector<8x8xf32>
    tpu.vector_store %arg23[%c0_30, %c0_31], %64 {strides = array<i32>} : memref<16x32xf32, #tpu.memory_space<vmem>>, vector<8x8xf32>,
    %66 = vector.extract_strided_slice %44 {offsets = [0, 8], sizes = [8, 8], strides = [1, 1]} : vector<16x96xf32> to vector<8x8xf32>
    %67 = vector.extract_strided_slice %44 {offsets = [0, 40], sizes = [8, 8], strides = [1, 1]} : vector<16x96xf32> to vector<8x8xf32>
    %68 = vector.extract_strided_slice %44 {offsets = [0, 72], sizes = [8, 8], strides = [1, 1]} : vector<16x96xf32> to vector<8x8xf32>
    %cst_32 = arith.constant dense<0.000000e+00> : vector<8x8xf32>
    %69 = tpu.matmul %66, %67, %cst_32 {dimension_numbers = #tpu.dot_dimension_numbers<[1], [1], [0], [0], [0, 0, 1, 0], [], []>} : vector<8x8xf32>, vector<8x8xf32>, vector<8x8xf32> -> vector<8x8xf32>
    %cst_33 = arith.constant 0.353553385 : f32
    %70 = vector.broadcast %cst_33 : f32 to vector<8x8xf32>
    %71 = arith.mulf %69, %70 : vector<8x8xf32>
    %72 = vector.broadcast %45 : vector<1x8xf32> to vector<8x8xf32>
    %73 = arith.addf %71, %72 : vector<8x8xf32>
    %cst_34 = arith.constant dense<0xFF800000> : vector<8xf32>
    %74 = vector.multi_reduction <maximumf>, %73, %cst_34 [1] : vector<8x8xf32> to vector<8xf32>
    %75 = vector.shape_cast %74 : vector<8xf32> to vector<8x1xf32>
    %76 = vector.broadcast %75 : vector<8x1xf32> to vector<8x8xf32>
    %77 = arith.subf %73, %76 : vector<8x8xf32>
    %78 = math.exp %77 : vector<8x8xf32>
    %cst_35 = arith.constant dense<0.000000e+00> : vector<8xf32>
    %79 = vector.multi_reduction <add>, %78, %cst_35 [1] : vector<8x8xf32> to vector<8xf32>
    %80 = vector.shape_cast %79 : vector<8xf32> to vector<8x1xf32>
    %81 = tpu.reciprocal %80 {approx = true} : vector<8x1xf32> -> vector<8x1xf32>
    %82 = vector.broadcast %81 : vector<8x1xf32> to vector<8x8xf32>
    %83 = arith.mulf %78, %82 : vector<8x8xf32>
    %cst_36 = arith.constant dense<0.000000e+00> : vector<8x8xf32>
    %84 = tpu.matmul %83, %68, %cst_36 {dimension_numbers = #tpu.dot_dimension_numbers<[1], [0], [0], [1], [0, 0, 1, 1], [], []>} : vector<8x8xf32>, vector<8x8xf32>, vector<8x8xf32> -> vector<8x8xf32>
    %c0_37 = arith.constant 0 : index
    %c8 = arith.constant 8 : index
    %85 = vector.load %arg23[%c0_37, %c8] : memref<16x32xf32, #tpu.memory_space<vmem>>, vector<8x8xf32>
    tpu.vector_store %arg23[%c0_37, %c8], %84 {strides = array<i32>} : memref<16x32xf32, #tpu.memory_space<vmem>>, vector<8x8xf32>,
    %86 = vector.extract_strided_slice %44 {offsets = [0, 16], sizes = [8, 8], strides = [1, 1]} : vector<16x96xf32> to vector<8x8xf32>
    %87 = vector.extract_strided_slice %44 {offsets = [0, 48], sizes = [8, 8], strides = [1, 1]} : vector<16x96xf32> to vector<8x8xf32>
    %88 = vector.extract_strided_slice %44 {offsets = [0, 80], sizes = [8, 8], strides = [1, 1]} : vector<16x96xf32> to vector<8x8xf32>
    %cst_38 = arith.constant dense<0.000000e+00> : vector<8x8xf32>
    %89 = tpu.matmul %86, %87, %cst_38 {dimension_numbers = #tpu.dot_dimension_numbers<[1], [1], [0], [0], [0, 0, 1, 0], [], []>} : vector<8x8xf32>, vector<8x8xf32>, vector<8x8xf32> -> vector<8x8xf32>
    %cst_39 = arith.constant 0.353553385 : f32
    %90 = vector.broadcast %cst_39 : f32 to vector<8x8xf32>
    %91 = arith.mulf %89, %90 : vector<8x8xf32>
    %92 = vector.broadcast %45 : vector<1x8xf32> to vector<8x8xf32>
    %93 = arith.addf %91, %92 : vector<8x8xf32>
    %cst_40 = arith.constant dense<0xFF800000> : vector<8xf32>
    %94 = vector.multi_reduction <maximumf>, %93, %cst_40 [1] : vector<8x8xf32> to vector<8xf32>
    %95 = vector.shape_cast %94 : vector<8xf32> to vector<8x1xf32>
    %96 = vector.broadcast %95 : vector<8x1xf32> to vector<8x8xf32>
    %97 = arith.subf %93, %96 : vector<8x8xf32>
    %98 = math.exp %97 : vector<8x8xf32>
    %cst_41 = arith.constant dense<0.000000e+00> : vector<8xf32>
    %99 = vector.multi_reduction <add>, %98, %cst_41 [1] : vector<8x8xf32> to vector<8xf32>
    %100 = vector.shape_cast %99 : vector<8xf32> to vector<8x1xf32>
    %101 = tpu.reciprocal %100 {approx = true} : vector<8x1xf32> -> vector<8x1xf32>
    %102 = vector.broadcast %101 : vector<8x1xf32> to vector<8x8xf32>
    %103 = arith.mulf %98, %102 : vector<8x8xf32>
    %cst_42 = arith.constant dense<0.000000e+00> : vector<8x8xf32>
    %104 = tpu.matmul %103, %88, %cst_42 {dimension_numbers = #tpu.dot_dimension_numbers<[1], [0], [0], [1], [0, 0, 1, 1], [], []>} : vector<8x8xf32>, vector<8x8xf32>, vector<8x8xf32> -> vector<8x8xf32>
    %c0_43 = arith.constant 0 : index
    %c16 = arith.constant 16 : index
    %105 = vector.load %arg23[%c0_43, %c16] : memref<16x32xf32, #tpu.memory_space<vmem>>, vector<8x8xf32>
    tpu.vector_store %arg23[%c0_43, %c16], %104 {strides = array<i32>} : memref<16x32xf32, #tpu.memory_space<vmem>>, vector<8x8xf32>,
    %106 = vector.extract_strided_slice %44 {offsets = [0, 24], sizes = [8, 8], strides = [1, 1]} : vector<16x96xf32> to vector<8x8xf32>
    %107 = vector.extract_strided_slice %44 {offsets = [0, 56], sizes = [8, 8], strides = [1, 1]} : vector<16x96xf32> to vector<8x8xf32>
    %108 = vector.extract_strided_slice %44 {offsets = [0, 88], sizes = [8, 8], strides = [1, 1]} : vector<16x96xf32> to vector<8x8xf32>
    %cst_44 = arith.constant dense<0.000000e+00> : vector<8x8xf32>
    %109 = tpu.matmul %106, %107, %cst_44 {dimension_numbers = #tpu.dot_dimension_numbers<[1], [1], [0], [0], [0, 0, 1, 0], [], []>} : vector<8x8xf32>, vector<8x8xf32>, vector<8x8xf32> -> vector<8x8xf32>
    %cst_45 = arith.constant 0.353553385 : f32
    %110 = vector.broadcast %cst_45 : f32 to vector<8x8xf32>
    %111 = arith.mulf %109, %110 : vector<8x8xf32>
    %112 = vector.broadcast %45 : vector<1x8xf32> to vector<8x8xf32>
    %113 = arith.addf %111, %112 : vector<8x8xf32>
    %cst_46 = arith.constant dense<0xFF800000> : vector<8xf32>
    %114 = vector.multi_reduction <maximumf>, %113, %cst_46 [1] : vector<8x8xf32> to vector<8xf32>
    %115 = vector.shape_cast %114 : vector<8xf32> to vector<8x1xf32>
    %116 = vector.broadcast %115 : vector<8x1xf32> to vector<8x8xf32>
    %117 = arith.subf %113, %116 : vector<8x8xf32>
    %118 = math.exp %117 : vector<8x8xf32>
    %cst_47 = arith.constant dense<0.000000e+00> : vector<8xf32>
    %119 = vector.multi_reduction <add>, %118, %cst_47 [1] : vector<8x8xf32> to vector<8xf32>
    %120 = vector.shape_cast %119 : vector<8xf32> to vector<8x1xf32>
    %121 = tpu.reciprocal %120 {approx = true} : vector<8x1xf32> -> vector<8x1xf32>
    %122 = vector.broadcast %121 : vector<8x1xf32> to vector<8x8xf32>
    %123 = arith.mulf %118, %122 : vector<8x8xf32>
    %cst_48 = arith.constant dense<0.000000e+00> : vector<8x8xf32>
    %124 = tpu.matmul %123, %108, %cst_48 {dimension_numbers = #tpu.dot_dimension_numbers<[1], [0], [0], [1], [0, 0, 1, 1], [], []>} : vector<8x8xf32>, vector<8x8xf32>, vector<8x8xf32> -> vector<8x8xf32>
    %c0_49 = arith.constant 0 : index
    %c24 = arith.constant 24 : index
    %125 = vector.load %arg23[%c0_49, %c24] : memref<16x32xf32, #tpu.memory_space<vmem>>, vector<8x8xf32>
    tpu.vector_store %arg23[%c0_49, %c24], %124 {strides = array<i32>} : memref<16x32xf32, #tpu.memory_space<vmem>>, vector<8x8xf32>,
    %126 = vector.extract_strided_slice %37 {offsets = [1, 0], sizes = [1, 8], strides = [1, 1]} : vector<2x8xf32> to vector<1x8xf32>
    %127 = vector.extract_strided_slice %44 {offsets = [8, 0], sizes = [8, 8], strides = [1, 1]} : vector<16x96xf32> to vector<8x8xf32>
    %128 = vector.extract_strided_slice %44 {offsets = [8, 32], sizes = [8, 8], strides = [1, 1]} : vector<16x96xf32> to vector<8x8xf32>
    %129 = vector.extract_strided_slice %44 {offsets = [8, 64], sizes = [8, 8], strides = [1, 1]} : vector<16x96xf32> to vector<8x8xf32>
    %cst_50 = arith.constant dense<0.000000e+00> : vector<8x8xf32>
    %130 = tpu.matmul %127, %128, %cst_50 {dimension_numbers = #tpu.dot_dimension_numbers<[1], [1], [0], [0], [0, 0, 1, 0], [], []>} : vector<8x8xf32>, vector<8x8xf32>, vector<8x8xf32> -> vector<8x8xf32>
    %cst_51 = arith.constant 0.353553385 : f32
    %131 = vector.broadcast %cst_51 : f32 to vector<8x8xf32>
    %132 = arith.mulf %130, %131 : vector<8x8xf32>
    %133 = vector.broadcast %126 : vector<1x8xf32> to vector<8x8xf32>
    %134 = arith.addf %132, %133 : vector<8x8xf32>
    %cst_52 = arith.constant dense<0xFF800000> : vector<8xf32>
    %135 = vector.multi_reduction <maximumf>, %134, %cst_52 [1] : vector<8x8xf32> to vector<8xf32>
    %136 = vector.shape_cast %135 : vector<8xf32> to vector<8x1xf32>
    %137 = vector.broadcast %136 : vector<8x1xf32> to vector<8x8xf32>
    %138 = arith.subf %134, %137 : vector<8x8xf32>
    %139 = math.exp %138 : vector<8x8xf32>
    %cst_53 = arith.constant dense<0.000000e+00> : vector<8xf32>
    %140 = vector.multi_reduction <add>, %139, %cst_53 [1] : vector<8x8xf32> to vector<8xf32>
    %141 = vector.shape_cast %140 : vector<8xf32> to vector<8x1xf32>
    %142 = tpu.reciprocal %141 {approx = true} : vector<8x1xf32> -> vector<8x1xf32>
    %143 = vector.broadcast %142 : vector<8x1xf32> to vector<8x8xf32>
    %144 = arith.mulf %139, %143 : vector<8x8xf32>
    %cst_54 = arith.constant dense<0.000000e+00> : vector<8x8xf32>
    %145 = tpu.matmul %144, %129, %cst_54 {dimension_numbers = #tpu.dot_dimension_numbers<[1], [0], [0], [1], [0, 0, 1, 1], [], []>} : vector<8x8xf32>, vector<8x8xf32>, vector<8x8xf32> -> vector<8x8xf32>
    %c8_55 = arith.constant 8 : index
    %c0_56 = arith.constant 0 : index
    %146 = vector.load %arg23[%c8_55, %c0_56] : memref<16x32xf32, #tpu.memory_space<vmem>>, vector<8x8xf32>
    tpu.vector_store %arg23[%c8_55, %c0_56], %145 {strides = array<i32>} : memref<16x32xf32, #tpu.memory_space<vmem>>, vector<8x8xf32>,
    %147 = vector.extract_strided_slice %44 {offsets = [8, 8], sizes = [8, 8], strides = [1, 1]} : vector<16x96xf32> to vector<8x8xf32>
    %148 = vector.extract_strided_slice %44 {offsets = [8, 40], sizes = [8, 8], strides = [1, 1]} : vector<16x96xf32> to vector<8x8xf32>
    %149 = vector.extract_strided_slice %44 {offsets = [8, 72], sizes = [8, 8], strides = [1, 1]} : vector<16x96xf32> to vector<8x8xf32>
    %cst_57 = arith.constant dense<0.000000e+00> : vector<8x8xf32>
    %150 = tpu.matmul %147, %148, %cst_57 {dimension_numbers = #tpu.dot_dimension_numbers<[1], [1], [0], [0], [0, 0, 1, 0], [], []>} : vector<8x8xf32>, vector<8x8xf32>, vector<8x8xf32> -> vector<8x8xf32>
    %cst_58 = arith.constant 0.353553385 : f32
    %151 = vector.broadcast %cst_58 : f32 to vector<8x8xf32>
    %152 = arith.mulf %150, %151 : vector<8x8xf32>
    %153 = vector.broadcast %126 : vector<1x8xf32> to vector<8x8xf32>
    %154 = arith.addf %152, %153 : vector<8x8xf32>
    %cst_59 = arith.constant dense<0xFF800000> : vector<8xf32>
    %155 = vector.multi_reduction <maximumf>, %154, %cst_59 [1] : vector<8x8xf32> to vector<8xf32>
    %156 = vector.shape_cast %155 : vector<8xf32> to vector<8x1xf32>
    %157 = vector.broadcast %156 : vector<8x1xf32> to vector<8x8xf32>
    %158 = arith.subf %154, %157 : vector<8x8xf32>
    %159 = math.exp %158 : vector<8x8xf32>
    %cst_60 = arith.constant dense<0.000000e+00> : vector<8xf32>
    %160 = vector.multi_reduction <add>, %159, %cst_60 [1] : vector<8x8xf32> to vector<8xf32>
    %161 = vector.shape_cast %160 : vector<8xf32> to vector<8x1xf32>
    %162 = tpu.reciprocal %161 {approx = true} : vector<8x1xf32> -> vector<8x1xf32>
    %163 = vector.broadcast %162 : vector<8x1xf32> to vector<8x8xf32>
    %164 = arith.mulf %159, %163 : vector<8x8xf32>
    %cst_61 = arith.constant dense<0.000000e+00> : vector<8x8xf32>
    %165 = tpu.matmul %164, %149, %cst_61 {dimension_numbers = #tpu.dot_dimension_numbers<[1], [0], [0], [1], [0, 0, 1, 1], [], []>} : vector<8x8xf32>, vector<8x8xf32>, vector<8x8xf32> -> vector<8x8xf32>
    %c8_62 = arith.constant 8 : index
    %c8_63 = arith.constant 8 : index
    %166 = vector.load %arg23[%c8_62, %c8_63] : memref<16x32xf32, #tpu.memory_space<vmem>>, vector<8x8xf32>
    tpu.vector_store %arg23[%c8_62, %c8_63], %165 {strides = array<i32>} : memref<16x32xf32, #tpu.memory_space<vmem>>, vector<8x8xf32>,
    %167 = vector.extract_strided_slice %44 {offsets = [8, 16], sizes = [8, 8], strides = [1, 1]} : vector<16x96xf32> to vector<8x8xf32>
    %168 = vector.extract_strided_slice %44 {offsets = [8, 48], sizes = [8, 8], strides = [1, 1]} : vector<16x96xf32> to vector<8x8xf32>
    %169 = vector.extract_strided_slice %44 {offsets = [8, 80], sizes = [8, 8], strides = [1, 1]} : vector<16x96xf32> to vector<8x8xf32>
    %cst_64 = arith.constant dense<0.000000e+00> : vector<8x8xf32>
    %170 = tpu.matmul %167, %168, %cst_64 {dimension_numbers = #tpu.dot_dimension_numbers<[1], [1], [0], [0], [0, 0, 1, 0], [], []>} : vector<8x8xf32>, vector<8x8xf32>, vector<8x8xf32> -> vector<8x8xf32>
    %cst_65 = arith.constant 0.353553385 : f32
    %171 = vector.broadcast %cst_65 : f32 to vector<8x8xf32>
    %172 = arith.mulf %170, %171 : vector<8x8xf32>
    %173 = vector.broadcast %126 : vector<1x8xf32> to vector<8x8xf32>
    %174 = arith.addf %172, %173 : vector<8x8xf32>
    %cst_66 = arith.constant dense<0xFF800000> : vector<8xf32>
    %175 = vector.multi_reduction <maximumf>, %174, %cst_66 [1] : vector<8x8xf32> to vector<8xf32>
    %176 = vector.shape_cast %175 : vector<8xf32> to vector<8x1xf32>
    %177 = vector.broadcast %176 : vector<8x1xf32> to vector<8x8xf32>
    %178 = arith.subf %174, %177 : vector<8x8xf32>
    %179 = math.exp %178 : vector<8x8xf32>
    %cst_67 = arith.constant dense<0.000000e+00> : vector<8xf32>
    %180 = vector.multi_reduction <add>, %179, %cst_67 [1] : vector<8x8xf32> to vector<8xf32>
    %181 = vector.shape_cast %180 : vector<8xf32> to vector<8x1xf32>
    %182 = tpu.reciprocal %181 {approx = true} : vector<8x1xf32> -> vector<8x1xf32>
    %183 = vector.broadcast %182 : vector<8x1xf32> to vector<8x8xf32>
    %184 = arith.mulf %179, %183 : vector<8x8xf32>
    %cst_68 = arith.constant dense<0.000000e+00> : vector<8x8xf32>
    %185 = tpu.matmul %184, %169, %cst_68 {dimension_numbers = #tpu.dot_dimension_numbers<[1], [0], [0], [1], [0, 0, 1, 1], [], []>} : vector<8x8xf32>, vector<8x8xf32>, vector<8x8xf32> -> vector<8x8xf32>
    %c8_69 = arith.constant 8 : index
    %c16_70 = arith.constant 16 : index
    %186 = vector.load %arg23[%c8_69, %c16_70] : memref<16x32xf32, #tpu.memory_space<vmem>>, vector<8x8xf32>
    tpu.vector_store %arg23[%c8_69, %c16_70], %185 {strides = array<i32>} : memref<16x32xf32, #tpu.memory_space<vmem>>, vector<8x8xf32>,
    %187 = vector.extract_strided_slice %44 {offsets = [8, 24], sizes = [8, 8], strides = [1, 1]} : vector<16x96xf32> to vector<8x8xf32>
    %188 = vector.extract_strided_slice %44 {offsets = [8, 56], sizes = [8, 8], strides = [1, 1]} : vector<16x96xf32> to vector<8x8xf32>
    %189 = vector.extract_strided_slice %44 {offsets = [8, 88], sizes = [8, 8], strides = [1, 1]} : vector<16x96xf32> to vector<8x8xf32>
    %cst_71 = arith.constant dense<0.000000e+00> : vector<8x8xf32>
    %190 = tpu.matmul %187, %188, %cst_71 {dimension_numbers = #tpu.dot_dimension_numbers<[1], [1], [0], [0], [0, 0, 1, 0], [], []>} : vector<8x8xf32>, vector<8x8xf32>, vector<8x8xf32> -> vector<8x8xf32>
    %cst_72 = arith.constant 0.353553385 : f32
    %191 = vector.broadcast %cst_72 : f32 to vector<8x8xf32>
    %192 = arith.mulf %190, %191 : vector<8x8xf32>
    %193 = vector.broadcast %126 : vector<1x8xf32> to vector<8x8xf32>
    %194 = arith.addf %192, %193 : vector<8x8xf32>
    %cst_73 = arith.constant dense<0xFF800000> : vector<8xf32>
    %195 = vector.multi_reduction <maximumf>, %194, %cst_73 [1] : vector<8x8xf32> to vector<8xf32>
    %196 = vector.shape_cast %195 : vector<8xf32> to vector<8x1xf32>
    %197 = vector.broadcast %196 : vector<8x1xf32> to vector<8x8xf32>
    %198 = arith.subf %194, %197 : vector<8x8xf32>
    %199 = math.exp %198 : vector<8x8xf32>
    %cst_74 = arith.constant dense<0.000000e+00> : vector<8xf32>
    %200 = vector.multi_reduction <add>, %199, %cst_74 [1] : vector<8x8xf32> to vector<8xf32>
    %201 = vector.shape_cast %200 : vector<8xf32> to vector<8x1xf32>
    %202 = tpu.reciprocal %201 {approx = true} : vector<8x1xf32> -> vector<8x1xf32>
    %203 = vector.broadcast %202 : vector<8x1xf32> to vector<8x8xf32>
    %204 = arith.mulf %199, %203 : vector<8x8xf32>
    %cst_75 = arith.constant dense<0.000000e+00> : vector<8x8xf32>
    %205 = tpu.matmul %204, %189, %cst_75 {dimension_numbers = #tpu.dot_dimension_numbers<[1], [0], [0], [1], [0, 0, 1, 1], [], []>} : vector<8x8xf32>, vector<8x8xf32>, vector<8x8xf32> -> vector<8x8xf32>
    %c8_76 = arith.constant 8 : index
    %c24_77 = arith.constant 24 : index
    %206 = vector.load %arg23[%c8_76, %c24_77] : memref<16x32xf32, #tpu.memory_space<vmem>>, vector<8x8xf32>
    tpu.vector_store %arg23[%c8_76, %c24_77], %205 {strides = array<i32>} : memref<16x32xf32, #tpu.memory_space<vmem>>, vector<8x8xf32>,
    %c0_78 = arith.constant 0 : index
    %c0_79 = arith.constant 0 : index
    %207 = vector.load %arg23[%c0_78, %c0_79] : memref<16x32xf32, #tpu.memory_space<vmem>>, vector<16x32xf32>
    %c0_80 = arith.constant 0 : index
    %c0_81 = arith.constant 0 : index
    %c0_82 = arith.constant 0 : index
    %208 = vector.load %arg8[%c0_80, %c0_81, %c0_82] : memref<2x32x32xf32, #tpu.memory_space<vmem>>, vector<1x32x32xf32>
    %209 = vector.shape_cast %208 : vector<1x32x32xf32> to vector<32x32xf32>
    %c0_83 = arith.constant 0 : index
    %c0_84 = arith.constant 0 : index
    %c0_85 = arith.constant 0 : index
    %210 = vector.load %arg9[%c0_83, %c0_84, %c0_85] : memref<2x1x32xf32, #tpu.memory_space<vmem>>, vector<1x1x32xf32>
    %211 = vector.shape_cast %210 : vector<1x1x32xf32> to vector<1x32xf32>
    %cst_86 = arith.constant dense<0.000000e+00> : vector<16x32xf32>
    %212 = tpu.matmul %207, %209, %cst_86 {dimension_numbers = #tpu.dot_dimension_numbers<[1], [0], [0], [1], [0, 0, 1, 1], [], []>} : vector<16x32xf32>, vector<32x32xf32>, vector<16x32xf32> -> vector<16x32xf32>
    %213 = vector.broadcast %211 : vector<1x32xf32> to vector<16x32xf32>
    %214 = arith.addf %212, %213 : vector<16x32xf32>
    %215 = arith.addf %214, %31 : vector<16x32xf32>
    %c0_87 = arith.constant 0 : index
    %c0_88 = arith.constant 0 : index
    %c0_89 = arith.constant 0 : index
    %216 = vector.load %arg10[%c0_87, %c0_88, %c0_89] : memref<2x1x32xf32, #tpu.memory_space<vmem>>, vector<1x1x32xf32>
    %217 = vector.shape_cast %216 : vector<1x1x32xf32> to vector<1x32xf32>
    %c0_90 = arith.constant 0 : index
    %c0_91 = arith.constant 0 : index
    %c0_92 = arith.constant 0 : index
    %218 = vector.load %arg11[%c0_90, %c0_91, %c0_92] : memref<2x1x32xf32, #tpu.memory_space<vmem>>, vector<1x1x32xf32>
    %219 = vector.shape_cast %218 : vector<1x1x32xf32> to vector<1x32xf32>
    %cst_93 = arith.constant dense<0.000000e+00> : vector<16xf32>
    %220 = vector.multi_reduction <add>, %215, %cst_93 [1] : vector<16x32xf32> to vector<16xf32>
    %221 = vector.shape_cast %220 : vector<16xf32> to vector<16x1xf32>
    %cst_94 = arith.constant 3.200000e+01 : f32
    %222 = vector.broadcast %cst_94 : f32 to vector<16x1xf32>
    %223 = arith.divf %221, %222 : vector<16x1xf32>
    %224 = vector.broadcast %223 : vector<16x1xf32> to vector<16x32xf32>
    %225 = arith.subf %215, %224 : vector<16x32xf32>
    %226 = arith.mulf %225, %225 : vector<16x32xf32>
    %cst_95 = arith.constant dense<0.000000e+00> : vector<16xf32>
    %227 = vector.multi_reduction <add>, %226, %cst_95 [1] : vector<16x32xf32> to vector<16xf32>
    %228 = vector.shape_cast %227 : vector<16xf32> to vector<16x1xf32>
    %cst_96 = arith.constant 3.200000e+01 : f32
    %229 = vector.broadcast %cst_96 : f32 to vector<16x1xf32>
    %230 = arith.divf %228, %229 : vector<16x1xf32>
    %cst_97 = arith.constant 9.99999996E-13 : f32
    %231 = vector.broadcast %cst_97 : f32 to vector<16x1xf32>
    %232 = arith.addf %230, %231 : vector<16x1xf32>
    %233 = math.rsqrt %232 : vector<16x1xf32>
    %234 = vector.broadcast %233 : vector<16x1xf32> to vector<16x32xf32>
    %235 = arith.mulf %225, %234 : vector<16x32xf32>
    %236 = vector.broadcast %217 : vector<1x32xf32> to vector<16x32xf32>
    %237 = arith.mulf %235, %236 : vector<16x32xf32>
    %238 = vector.broadcast %219 : vector<1x32xf32> to vector<16x32xf32>
    %239 = arith.addf %237, %238 : vector<16x32xf32>
    %c0_98 = arith.constant 0 : index
    %c0_99 = arith.constant 0 : index
    %c0_100 = arith.constant 0 : index
    %240 = vector.load %arg12[%c0_98, %c0_99, %c0_100] : memref<2x32x64xf32, #tpu.memory_space<vmem>>, vector<1x32x64xf32>
    %241 = vector.shape_cast %240 : vector<1x32x64xf32> to vector<32x64xf32>
    %c0_101 = arith.constant 0 : index
    %c0_102 = arith.constant 0 : index
    %c0_103 = arith.constant 0 : index
    %242 = vector.load %arg13[%c0_101, %c0_102, %c0_103] : memref<2x1x64xf32, #tpu.memory_space<vmem>>, vector<1x1x64xf32>
    %243 = vector.shape_cast %242 : vector<1x1x64xf32> to vector<1x64xf32>
    %cst_104 = arith.constant dense<0.000000e+00> : vector<16x64xf32>
    %244 = tpu.matmul %239, %241, %cst_104 {dimension_numbers = #tpu.dot_dimension_numbers<[1], [0], [0], [1], [0, 0, 1, 1], [], []>} : vector<16x32xf32>, vector<32x64xf32>, vector<16x64xf32> -> vector<16x64xf32>
    %245 = vector.broadcast %243 : vector<1x64xf32> to vector<16x64xf32>
    %246 = arith.addf %244, %245 : vector<16x64xf32>
    %cst_105 = arith.constant 5.000000e-01 : f32
    %247 = vector.broadcast %cst_105 : f32 to vector<16x64xf32>
    %248 = arith.mulf %247, %246 : vector<16x64xf32>
    %cst_106 = arith.constant 4.471500e-02 : f32
    %249 = vector.broadcast %cst_106 : f32 to vector<16x64xf32>
    %250 = arith.mulf %249, %246 : vector<16x64xf32>
    %251 = arith.mulf %250, %246 : vector<16x64xf32>
    %252 = arith.mulf %251, %246 : vector<16x64xf32>
    %253 = arith.addf %246, %252 : vector<16x64xf32>
    %cst_107 = arith.constant 0.797884583 : f32
    %254 = vector.broadcast %cst_107 : f32 to vector<16x64xf32>
    %255 = arith.mulf %254, %253 : vector<16x64xf32>
    %256 = math.tanh %255 : vector<16x64xf32>
    %cst_108 = arith.constant 1.000000e+00 : f32
    %257 = vector.broadcast %cst_108 : f32 to vector<16x64xf32>
    %258 = arith.addf %257, %256 : vector<16x64xf32>
    %259 = arith.mulf %248, %258 : vector<16x64xf32>
    %c0_109 = arith.constant 0 : index
    %c0_110 = arith.constant 0 : index
    %c0_111 = arith.constant 0 : index
    %260 = vector.load %arg14[%c0_109, %c0_110, %c0_111] : memref<2x64x32xf32, #tpu.memory_space<vmem>>, vector<1x64x32xf32>
    %261 = vector.shape_cast %260 : vector<1x64x32xf32> to vector<64x32xf32>
    %c0_112 = arith.constant 0 : index
    %c0_113 = arith.constant 0 : index
    %c0_114 = arith.constant 0 : index
    %262 = vector.load %arg15[%c0_112, %c0_113, %c0_114] : memref<2x1x32xf32, #tpu.memory_space<vmem>>, vector<1x1x32xf32>
    %263 = vector.shape_cast %262 : vector<1x1x32xf32> to vector<1x32xf32>
    %cst_115 = arith.constant dense<0.000000e+00> : vector<16x32xf32>
    %264 = tpu.matmul %259, %261, %cst_115 {dimension_numbers = #tpu.dot_dimension_numbers<[1], [0], [0], [1], [0, 0, 1, 1], [], []>} : vector<16x64xf32>, vector<64x32xf32>, vector<16x32xf32> -> vector<16x32xf32>
    %265 = vector.broadcast %263 : vector<1x32xf32> to vector<16x32xf32>
    %266 = arith.addf %264, %265 : vector<16x32xf32>
    %267 = arith.addf %266, %239 : vector<16x32xf32>
    %c0_116 = arith.constant 0 : index
    %c0_117 = arith.constant 0 : index
    %c0_118 = arith.constant 0 : index
    %268 = vector.load %arg16[%c0_116, %c0_117, %c0_118] : memref<2x1x32xf32, #tpu.memory_space<vmem>>, vector<1x1x32xf32>
    %269 = vector.shape_cast %268 : vector<1x1x32xf32> to vector<1x32xf32>
    %c0_119 = arith.constant 0 : index
    %c0_120 = arith.constant 0 : index
    %c0_121 = arith.constant 0 : index
    %270 = vector.load %arg17[%c0_119, %c0_120, %c0_121] : memref<2x1x32xf32, #tpu.memory_space<vmem>>, vector<1x1x32xf32>
    %271 = vector.shape_cast %270 : vector<1x1x32xf32> to vector<1x32xf32>
    %cst_122 = arith.constant dense<0.000000e+00> : vector<16xf32>
    %272 = vector.multi_reduction <add>, %267, %cst_122 [1] : vector<16x32xf32> to vector<16xf32>
    %273 = vector.shape_cast %272 : vector<16xf32> to vector<16x1xf32>
    %cst_123 = arith.constant 3.200000e+01 : f32
    %274 = vector.broadcast %cst_123 : f32 to vector<16x1xf32>
    %275 = arith.divf %273, %274 : vector<16x1xf32>
    %276 = vector.broadcast %275 : vector<16x1xf32> to vector<16x32xf32>
    %277 = arith.subf %267, %276 : vector<16x32xf32>
    %278 = arith.mulf %277, %277 : vector<16x32xf32>
    %cst_124 = arith.constant dense<0.000000e+00> : vector<16xf32>
    %279 = vector.multi_reduction <add>, %278, %cst_124 [1] : vector<16x32xf32> to vector<16xf32>
    %280 = vector.shape_cast %279 : vector<16xf32> to vector<16x1xf32>
    %cst_125 = arith.constant 3.200000e+01 : f32
    %281 = vector.broadcast %cst_125 : f32 to vector<16x1xf32>
    %282 = arith.divf %280, %281 : vector<16x1xf32>
    %cst_126 = arith.constant 9.99999996E-13 : f32
    %283 = vector.broadcast %cst_126 : f32 to vector<16x1xf32>
    %284 = arith.addf %282, %283 : vector<16x1xf32>
    %285 = math.rsqrt %284 : vector<16x1xf32>
    %286 = vector.broadcast %285 : vector<16x1xf32> to vector<16x32xf32>
    %287 = arith.mulf %277, %286 : vector<16x32xf32>
    %288 = vector.broadcast %269 : vector<1x32xf32> to vector<16x32xf32>
    %289 = arith.mulf %287, %288 : vector<16x32xf32>
    %290 = vector.broadcast %271 : vector<1x32xf32> to vector<16x32xf32>
    %291 = arith.addf %289, %290 : vector<16x32xf32>
    %c1 = arith.constant 1 : index
    %c0_127 = arith.constant 0 : index
    %c0_128 = arith.constant 0 : index
    %292 = vector.load %arg6[%c1, %c0_127, %c0_128] : memref<2x32x96xf32, #tpu.memory_space<vmem>>, vector<1x32x96xf32>
    %293 = vector.shape_cast %292 : vector<1x32x96xf32> to vector<32x96xf32>
    %c1_129 = arith.constant 1 : index
    %c0_130 = arith.constant 0 : index
    %c0_131 = arith.constant 0 : index
    %294 = vector.load %arg7[%c1_129, %c0_130, %c0_131] : memref<2x1x96xf32, #tpu.memory_space<vmem>>, vector<1x1x96xf32>
    %295 = vector.shape_cast %294 : vector<1x1x96xf32> to vector<1x96xf32>
    %cst_132 = arith.constant dense<0.000000e+00> : vector<16x96xf32>
    %296 = tpu.matmul %291, %293, %cst_132 {dimension_numbers = #tpu.dot_dimension_numbers<[1], [0], [0], [1], [0, 0, 1, 1], [], []>} : vector<16x32xf32>, vector<32x96xf32>, vector<16x96xf32> -> vector<16x96xf32>
    %297 = vector.broadcast %295 : vector<1x96xf32> to vector<16x96xf32>
    %298 = arith.addf %296, %297 : vector<16x96xf32>
    %299 = vector.extract_strided_slice %37 {offsets = [0, 0], sizes = [1, 8], strides = [1, 1]} : vector<2x8xf32> to vector<1x8xf32>
    %300 = vector.extract_strided_slice %298 {offsets = [0, 0], sizes = [8, 8], strides = [1, 1]} : vector<16x96xf32> to vector<8x8xf32>
    %301 = vector.extract_strided_slice %298 {offsets = [0, 32], sizes = [8, 8], strides = [1, 1]} : vector<16x96xf32> to vector<8x8xf32>
    %302 = vector.extract_strided_slice %298 {offsets = [0, 64], sizes = [8, 8], strides = [1, 1]} : vector<16x96xf32> to vector<8x8xf32>
    %cst_133 = arith.constant dense<0.000000e+00> : vector<8x8xf32>
    %303 = tpu.matmul %300, %301, %cst_133 {dimension_numbers = #tpu.dot_dimension_numbers<[1], [1], [0], [0], [0, 0, 1, 0], [], []>} : vector<8x8xf32>, vector<8x8xf32>, vector<8x8xf32> -> vector<8x8xf32>
    %cst_134 = arith.constant 0.353553385 : f32
    %304 = vector.broadcast %cst_134 : f32 to vector<8x8xf32>
    %305 = arith.mulf %303, %304 : vector<8x8xf32>
    %306 = vector.broadcast %299 : vector<1x8xf32> to vector<8x8xf32>
    %307 = arith.addf %305, %306 : vector<8x8xf32>
    %cst_135 = arith.constant dense<0xFF800000> : vector<8xf32>
    %308 = vector.multi_reduction <maximumf>, %307, %cst_135 [1] : vector<8x8xf32> to vector<8xf32>
    %309 = vector.shape_cast %308 : vector<8xf32> to vector<8x1xf32>
    %310 = vector.broadcast %309 : vector<8x1xf32> to vector<8x8xf32>
    %311 = arith.subf %307, %310 : vector<8x8xf32>
    %312 = math.exp %311 : vector<8x8xf32>
    %cst_136 = arith.constant dense<0.000000e+00> : vector<8xf32>
    %313 = vector.multi_reduction <add>, %312, %cst_136 [1] : vector<8x8xf32> to vector<8xf32>
    %314 = vector.shape_cast %313 : vector<8xf32> to vector<8x1xf32>
    %315 = tpu.reciprocal %314 {approx = true} : vector<8x1xf32> -> vector<8x1xf32>
    %316 = vector.broadcast %315 : vector<8x1xf32> to vector<8x8xf32>
    %317 = arith.mulf %312, %316 : vector<8x8xf32>
    %cst_137 = arith.constant dense<0.000000e+00> : vector<8x8xf32>
    %318 = tpu.matmul %317, %302, %cst_137 {dimension_numbers = #tpu.dot_dimension_numbers<[1], [0], [0], [1], [0, 0, 1, 1], [], []>} : vector<8x8xf32>, vector<8x8xf32>, vector<8x8xf32> -> vector<8x8xf32>
    %c0_138 = arith.constant 0 : index
    %c0_139 = arith.constant 0 : index
    %319 = vector.load %arg23[%c0_138, %c0_139] : memref<16x32xf32, #tpu.memory_space<vmem>>, vector<8x8xf32>
    tpu.vector_store %arg23[%c0_138, %c0_139], %318 {strides = array<i32>} : memref<16x32xf32, #tpu.memory_space<vmem>>, vector<8x8xf32>,
    %320 = vector.extract_strided_slice %298 {offsets = [0, 8], sizes = [8, 8], strides = [1, 1]} : vector<16x96xf32> to vector<8x8xf32>
    %321 = vector.extract_strided_slice %298 {offsets = [0, 40], sizes = [8, 8], strides = [1, 1]} : vector<16x96xf32> to vector<8x8xf32>
    %322 = vector.extract_strided_slice %298 {offsets = [0, 72], sizes = [8, 8], strides = [1, 1]} : vector<16x96xf32> to vector<8x8xf32>
    %cst_140 = arith.constant dense<0.000000e+00> : vector<8x8xf32>
    %323 = tpu.matmul %320, %321, %cst_140 {dimension_numbers = #tpu.dot_dimension_numbers<[1], [1], [0], [0], [0, 0, 1, 0], [], []>} : vector<8x8xf32>, vector<8x8xf32>, vector<8x8xf32> -> vector<8x8xf32>
    %cst_141 = arith.constant 0.353553385 : f32
    %324 = vector.broadcast %cst_141 : f32 to vector<8x8xf32>
    %325 = arith.mulf %323, %324 : vector<8x8xf32>
    %326 = vector.broadcast %299 : vector<1x8xf32> to vector<8x8xf32>
    %327 = arith.addf %325, %326 : vector<8x8xf32>
    %cst_142 = arith.constant dense<0xFF800000> : vector<8xf32>
    %328 = vector.multi_reduction <maximumf>, %327, %cst_142 [1] : vector<8x8xf32> to vector<8xf32>
    %329 = vector.shape_cast %328 : vector<8xf32> to vector<8x1xf32>
    %330 = vector.broadcast %329 : vector<8x1xf32> to vector<8x8xf32>
    %331 = arith.subf %327, %330 : vector<8x8xf32>
    %332 = math.exp %331 : vector<8x8xf32>
    %cst_143 = arith.constant dense<0.000000e+00> : vector<8xf32>
    %333 = vector.multi_reduction <add>, %332, %cst_143 [1] : vector<8x8xf32> to vector<8xf32>
    %334 = vector.shape_cast %333 : vector<8xf32> to vector<8x1xf32>
    %335 = tpu.reciprocal %334 {approx = true} : vector<8x1xf32> -> vector<8x1xf32>
    %336 = vector.broadcast %335 : vector<8x1xf32> to vector<8x8xf32>
    %337 = arith.mulf %332, %336 : vector<8x8xf32>
    %cst_144 = arith.constant dense<0.000000e+00> : vector<8x8xf32>
    %338 = tpu.matmul %337, %322, %cst_144 {dimension_numbers = #tpu.dot_dimension_numbers<[1], [0], [0], [1], [0, 0, 1, 1], [], []>} : vector<8x8xf32>, vector<8x8xf32>, vector<8x8xf32> -> vector<8x8xf32>
    %c0_145 = arith.constant 0 : index
    %c8_146 = arith.constant 8 : index
    %339 = vector.load %arg23[%c0_145, %c8_146] : memref<16x32xf32, #tpu.memory_space<vmem>>, vector<8x8xf32>
    tpu.vector_store %arg23[%c0_145, %c8_146], %338 {strides = array<i32>} : memref<16x32xf32, #tpu.memory_space<vmem>>, vector<8x8xf32>,
    %340 = vector.extract_strided_slice %298 {offsets = [0, 16], sizes = [8, 8], strides = [1, 1]} : vector<16x96xf32> to vector<8x8xf32>
    %341 = vector.extract_strided_slice %298 {offsets = [0, 48], sizes = [8, 8], strides = [1, 1]} : vector<16x96xf32> to vector<8x8xf32>
    %342 = vector.extract_strided_slice %298 {offsets = [0, 80], sizes = [8, 8], strides = [1, 1]} : vector<16x96xf32> to vector<8x8xf32>
    %cst_147 = arith.constant dense<0.000000e+00> : vector<8x8xf32>
    %343 = tpu.matmul %340, %341, %cst_147 {dimension_numbers = #tpu.dot_dimension_numbers<[1], [1], [0], [0], [0, 0, 1, 0], [], []>} : vector<8x8xf32>, vector<8x8xf32>, vector<8x8xf32> -> vector<8x8xf32>
    %cst_148 = arith.constant 0.353553385 : f32
    %344 = vector.broadcast %cst_148 : f32 to vector<8x8xf32>
    %345 = arith.mulf %343, %344 : vector<8x8xf32>
    %346 = vector.broadcast %299 : vector<1x8xf32> to vector<8x8xf32>
    %347 = arith.addf %345, %346 : vector<8x8xf32>
    %cst_149 = arith.constant dense<0xFF800000> : vector<8xf32>
    %348 = vector.multi_reduction <maximumf>, %347, %cst_149 [1] : vector<8x8xf32> to vector<8xf32>
    %349 = vector.shape_cast %348 : vector<8xf32> to vector<8x1xf32>
    %350 = vector.broadcast %349 : vector<8x1xf32> to vector<8x8xf32>
    %351 = arith.subf %347, %350 : vector<8x8xf32>
    %352 = math.exp %351 : vector<8x8xf32>
    %cst_150 = arith.constant dense<0.000000e+00> : vector<8xf32>
    %353 = vector.multi_reduction <add>, %352, %cst_150 [1] : vector<8x8xf32> to vector<8xf32>
    %354 = vector.shape_cast %353 : vector<8xf32> to vector<8x1xf32>
    %355 = tpu.reciprocal %354 {approx = true} : vector<8x1xf32> -> vector<8x1xf32>
    %356 = vector.broadcast %355 : vector<8x1xf32> to vector<8x8xf32>
    %357 = arith.mulf %352, %356 : vector<8x8xf32>
    %cst_151 = arith.constant dense<0.000000e+00> : vector<8x8xf32>
    %358 = tpu.matmul %357, %342, %cst_151 {dimension_numbers = #tpu.dot_dimension_numbers<[1], [0], [0], [1], [0, 0, 1, 1], [], []>} : vector<8x8xf32>, vector<8x8xf32>, vector<8x8xf32> -> vector<8x8xf32>
    %c0_152 = arith.constant 0 : index
    %c16_153 = arith.constant 16 : index
    %359 = vector.load %arg23[%c0_152, %c16_153] : memref<16x32xf32, #tpu.memory_space<vmem>>, vector<8x8xf32>
    tpu.vector_store %arg23[%c0_152, %c16_153], %358 {strides = array<i32>} : memref<16x32xf32, #tpu.memory_space<vmem>>, vector<8x8xf32>,
    %360 = vector.extract_strided_slice %298 {offsets = [0, 24], sizes = [8, 8], strides = [1, 1]} : vector<16x96xf32> to vector<8x8xf32>
    %361 = vector.extract_strided_slice %298 {offsets = [0, 56], sizes = [8, 8], strides = [1, 1]} : vector<16x96xf32> to vector<8x8xf32>
    %362 = vector.extract_strided_slice %298 {offsets = [0, 88], sizes = [8, 8], strides = [1, 1]} : vector<16x96xf32> to vector<8x8xf32>
    %cst_154 = arith.constant dense<0.000000e+00> : vector<8x8xf32>
    %363 = tpu.matmul %360, %361, %cst_154 {dimension_numbers = #tpu.dot_dimension_numbers<[1], [1], [0], [0], [0, 0, 1, 0], [], []>} : vector<8x8xf32>, vector<8x8xf32>, vector<8x8xf32> -> vector<8x8xf32>
    %cst_155 = arith.constant 0.353553385 : f32
    %364 = vector.broadcast %cst_155 : f32 to vector<8x8xf32>
    %365 = arith.mulf %363, %364 : vector<8x8xf32>
    %366 = vector.broadcast %299 : vector<1x8xf32> to vector<8x8xf32>
    %367 = arith.addf %365, %366 : vector<8x8xf32>
    %cst_156 = arith.constant dense<0xFF800000> : vector<8xf32>
    %368 = vector.multi_reduction <maximumf>, %367, %cst_156 [1] : vector<8x8xf32> to vector<8xf32>
    %369 = vector.shape_cast %368 : vector<8xf32> to vector<8x1xf32>
    %370 = vector.broadcast %369 : vector<8x1xf32> to vector<8x8xf32>
    %371 = arith.subf %367, %370 : vector<8x8xf32>
    %372 = math.exp %371 : vector<8x8xf32>
    %cst_157 = arith.constant dense<0.000000e+00> : vector<8xf32>
    %373 = vector.multi_reduction <add>, %372, %cst_157 [1] : vector<8x8xf32> to vector<8xf32>
    %374 = vector.shape_cast %373 : vector<8xf32> to vector<8x1xf32>
    %375 = tpu.reciprocal %374 {approx = true} : vector<8x1xf32> -> vector<8x1xf32>
    %376 = vector.broadcast %375 : vector<8x1xf32> to vector<8x8xf32>
    %377 = arith.mulf %372, %376 : vector<8x8xf32>
    %cst_158 = arith.constant dense<0.000000e+00> : vector<8x8xf32>
    %378 = tpu.matmul %377, %362, %cst_158 {dimension_numbers = #tpu.dot_dimension_numbers<[1], [0], [0], [1], [0, 0, 1, 1], [], []>} : vector<8x8xf32>, vector<8x8xf32>, vector<8x8xf32> -> vector<8x8xf32>
    %c0_159 = arith.constant 0 : index
    %c24_160 = arith.constant 24 : index
    %379 = vector.load %arg23[%c0_159, %c24_160] : memref<16x32xf32, #tpu.memory_space<vmem>>, vector<8x8xf32>
    tpu.vector_store %arg23[%c0_159, %c24_160], %378 {strides = array<i32>} : memref<16x32xf32, #tpu.memory_space<vmem>>, vector<8x8xf32>,
    %380 = vector.extract_strided_slice %37 {offsets = [1, 0], sizes = [1, 8], strides = [1, 1]} : vector<2x8xf32> to vector<1x8xf32>
    %381 = vector.extract_strided_slice %298 {offsets = [8, 0], sizes = [8, 8], strides = [1, 1]} : vector<16x96xf32> to vector<8x8xf32>
    %382 = vector.extract_strided_slice %298 {offsets = [8, 32], sizes = [8, 8], strides = [1, 1]} : vector<16x96xf32> to vector<8x8xf32>
    %383 = vector.extract_strided_slice %298 {offsets = [8, 64], sizes = [8, 8], strides = [1, 1]} : vector<16x96xf32> to vector<8x8xf32>
    %cst_161 = arith.constant dense<0.000000e+00> : vector<8x8xf32>
    %384 = tpu.matmul %381, %382, %cst_161 {dimension_numbers = #tpu.dot_dimension_numbers<[1], [1], [0], [0], [0, 0, 1, 0], [], []>} : vector<8x8xf32>, vector<8x8xf32>, vector<8x8xf32> -> vector<8x8xf32>
    %cst_162 = arith.constant 0.353553385 : f32
    %385 = vector.broadcast %cst_162 : f32 to vector<8x8xf32>
    %386 = arith.mulf %384, %385 : vector<8x8xf32>
    %387 = vector.broadcast %380 : vector<1x8xf32> to vector<8x8xf32>
    %388 = arith.addf %386, %387 : vector<8x8xf32>
    %cst_163 = arith.constant dense<0xFF800000> : vector<8xf32>
    %389 = vector.multi_reduction <maximumf>, %388, %cst_163 [1] : vector<8x8xf32> to vector<8xf32>
    %390 = vector.shape_cast %389 : vector<8xf32> to vector<8x1xf32>
    %391 = vector.broadcast %390 : vector<8x1xf32> to vector<8x8xf32>
    %392 = arith.subf %388, %391 : vector<8x8xf32>
    %393 = math.exp %392 : vector<8x8xf32>
    %cst_164 = arith.constant dense<0.000000e+00> : vector<8xf32>
    %394 = vector.multi_reduction <add>, %393, %cst_164 [1] : vector<8x8xf32> to vector<8xf32>
    %395 = vector.shape_cast %394 : vector<8xf32> to vector<8x1xf32>
    %396 = tpu.reciprocal %395 {approx = true} : vector<8x1xf32> -> vector<8x1xf32>
    %397 = vector.broadcast %396 : vector<8x1xf32> to vector<8x8xf32>
    %398 = arith.mulf %393, %397 : vector<8x8xf32>
    %cst_165 = arith.constant dense<0.000000e+00> : vector<8x8xf32>
    %399 = tpu.matmul %398, %383, %cst_165 {dimension_numbers = #tpu.dot_dimension_numbers<[1], [0], [0], [1], [0, 0, 1, 1], [], []>} : vector<8x8xf32>, vector<8x8xf32>, vector<8x8xf32> -> vector<8x8xf32>
    %c8_166 = arith.constant 8 : index
    %c0_167 = arith.constant 0 : index
    %400 = vector.load %arg23[%c8_166, %c0_167] : memref<16x32xf32, #tpu.memory_space<vmem>>, vector<8x8xf32>
    tpu.vector_store %arg23[%c8_166, %c0_167], %399 {strides = array<i32>} : memref<16x32xf32, #tpu.memory_space<vmem>>, vector<8x8xf32>,
    %401 = vector.extract_strided_slice %298 {offsets = [8, 8], sizes = [8, 8], strides = [1, 1]} : vector<16x96xf32> to vector<8x8xf32>
    %402 = vector.extract_strided_slice %298 {offsets = [8, 40], sizes = [8, 8], strides = [1, 1]} : vector<16x96xf32> to vector<8x8xf32>
    %403 = vector.extract_strided_slice %298 {offsets = [8, 72], sizes = [8, 8], strides = [1, 1]} : vector<16x96xf32> to vector<8x8xf32>
    %cst_168 = arith.constant dense<0.000000e+00> : vector<8x8xf32>
    %404 = tpu.matmul %401, %402, %cst_168 {dimension_numbers = #tpu.dot_dimension_numbers<[1], [1], [0], [0], [0, 0, 1, 0], [], []>} : vector<8x8xf32>, vector<8x8xf32>, vector<8x8xf32> -> vector<8x8xf32>
    %cst_169 = arith.constant 0.353553385 : f32
    %405 = vector.broadcast %cst_169 : f32 to vector<8x8xf32>
    %406 = arith.mulf %404, %405 : vector<8x8xf32>
    %407 = vector.broadcast %380 : vector<1x8xf32> to vector<8x8xf32>
    %408 = arith.addf %406, %407 : vector<8x8xf32>
    %cst_170 = arith.constant dense<0xFF800000> : vector<8xf32>
    %409 = vector.multi_reduction <maximumf>, %408, %cst_170 [1] : vector<8x8xf32> to vector<8xf32>
    %410 = vector.shape_cast %409 : vector<8xf32> to vector<8x1xf32>
    %411 = vector.broadcast %410 : vector<8x1xf32> to vector<8x8xf32>
    %412 = arith.subf %408, %411 : vector<8x8xf32>
    %413 = math.exp %412 : vector<8x8xf32>
    %cst_171 = arith.constant dense<0.000000e+00> : vector<8xf32>
    %414 = vector.multi_reduction <add>, %413, %cst_171 [1] : vector<8x8xf32> to vector<8xf32>
    %415 = vector.shape_cast %414 : vector<8xf32> to vector<8x1xf32>
    %416 = tpu.reciprocal %415 {approx = true} : vector<8x1xf32> -> vector<8x1xf32>
    %417 = vector.broadcast %416 : vector<8x1xf32> to vector<8x8xf32>
    %418 = arith.mulf %413, %417 : vector<8x8xf32>
    %cst_172 = arith.constant dense<0.000000e+00> : vector<8x8xf32>
    %419 = tpu.matmul %418, %403, %cst_172 {dimension_numbers = #tpu.dot_dimension_numbers<[1], [0], [0], [1], [0, 0, 1, 1], [], []>} : vector<8x8xf32>, vector<8x8xf32>, vector<8x8xf32> -> vector<8x8xf32>
    %c8_173 = arith.constant 8 : index
    %c8_174 = arith.constant 8 : index
    %420 = vector.load %arg23[%c8_173, %c8_174] : memref<16x32xf32, #tpu.memory_space<vmem>>, vector<8x8xf32>
    tpu.vector_store %arg23[%c8_173, %c8_174], %419 {strides = array<i32>} : memref<16x32xf32, #tpu.memory_space<vmem>>, vector<8x8xf32>,
    %421 = vector.extract_strided_slice %298 {offsets = [8, 16], sizes = [8, 8], strides = [1, 1]} : vector<16x96xf32> to vector<8x8xf32>
    %422 = vector.extract_strided_slice %298 {offsets = [8, 48], sizes = [8, 8], strides = [1, 1]} : vector<16x96xf32> to vector<8x8xf32>
    %423 = vector.extract_strided_slice %298 {offsets = [8, 80], sizes = [8, 8], strides = [1, 1]} : vector<16x96xf32> to vector<8x8xf32>
    %cst_175 = arith.constant dense<0.000000e+00> : vector<8x8xf32>
    %424 = tpu.matmul %421, %422, %cst_175 {dimension_numbers = #tpu.dot_dimension_numbers<[1], [1], [0], [0], [0, 0, 1, 0], [], []>} : vector<8x8xf32>, vector<8x8xf32>, vector<8x8xf32> -> vector<8x8xf32>
    %cst_176 = arith.constant 0.353553385 : f32
    %425 = vector.broadcast %cst_176 : f32 to vector<8x8xf32>
    %426 = arith.mulf %424, %425 : vector<8x8xf32>
    %427 = vector.broadcast %380 : vector<1x8xf32> to vector<8x8xf32>
    %428 = arith.addf %426, %427 : vector<8x8xf32>
    %cst_177 = arith.constant dense<0xFF800000> : vector<8xf32>
    %429 = vector.multi_reduction <maximumf>, %428, %cst_177 [1] : vector<8x8xf32> to vector<8xf32>
    %430 = vector.shape_cast %429 : vector<8xf32> to vector<8x1xf32>
    %431 = vector.broadcast %430 : vector<8x1xf32> to vector<8x8xf32>
    %432 = arith.subf %428, %431 : vector<8x8xf32>
    %433 = math.exp %432 : vector<8x8xf32>
    %cst_178 = arith.constant dense<0.000000e+00> : vector<8xf32>
    %434 = vector.multi_reduction <add>, %433, %cst_178 [1] : vector<8x8xf32> to vector<8xf32>
    %435 = vector.shape_cast %434 : vector<8xf32> to vector<8x1xf32>
    %436 = tpu.reciprocal %435 {approx = true} : vector<8x1xf32> -> vector<8x1xf32>
    %437 = vector.broadcast %436 : vector<8x1xf32> to vector<8x8xf32>
    %438 = arith.mulf %433, %437 : vector<8x8xf32>
    %cst_179 = arith.constant dense<0.000000e+00> : vector<8x8xf32>
    %439 = tpu.matmul %438, %423, %cst_179 {dimension_numbers = #tpu.dot_dimension_numbers<[1], [0], [0], [1], [0, 0, 1, 1], [], []>} : vector<8x8xf32>, vector<8x8xf32>, vector<8x8xf32> -> vector<8x8xf32>
    %c8_180 = arith.constant 8 : index
    %c16_181 = arith.constant 16 : index
    %440 = vector.load %arg23[%c8_180, %c16_181] : memref<16x32xf32, #tpu.memory_space<vmem>>, vector<8x8xf32>
    tpu.vector_store %arg23[%c8_180, %c16_181], %439 {strides = array<i32>} : memref<16x32xf32, #tpu.memory_space<vmem>>, vector<8x8xf32>,
    %441 = vector.extract_strided_slice %298 {offsets = [8, 24], sizes = [8, 8], strides = [1, 1]} : vector<16x96xf32> to vector<8x8xf32>
    %442 = vector.extract_strided_slice %298 {offsets = [8, 56], sizes = [8, 8], strides = [1, 1]} : vector<16x96xf32> to vector<8x8xf32>
    %443 = vector.extract_strided_slice %298 {offsets = [8, 88], sizes = [8, 8], strides = [1, 1]} : vector<16x96xf32> to vector<8x8xf32>
    %cst_182 = arith.constant dense<0.000000e+00> : vector<8x8xf32>
    %444 = tpu.matmul %441, %442, %cst_182 {dimension_numbers = #tpu.dot_dimension_numbers<[1], [1], [0], [0], [0, 0, 1, 0], [], []>} : vector<8x8xf32>, vector<8x8xf32>, vector<8x8xf32> -> vector<8x8xf32>
    %cst_183 = arith.constant 0.353553385 : f32
    %445 = vector.broadcast %cst_183 : f32 to vector<8x8xf32>
    %446 = arith.mulf %444, %445 : vector<8x8xf32>
    %447 = vector.broadcast %380 : vector<1x8xf32> to vector<8x8xf32>
    %448 = arith.addf %446, %447 : vector<8x8xf32>
    %cst_184 = arith.constant dense<0xFF800000> : vector<8xf32>
    %449 = vector.multi_reduction <maximumf>, %448, %cst_184 [1] : vector<8x8xf32> to vector<8xf32>
    %450 = vector.shape_cast %449 : vector<8xf32> to vector<8x1xf32>
    %451 = vector.broadcast %450 : vector<8x1xf32> to vector<8x8xf32>
    %452 = arith.subf %448, %451 : vector<8x8xf32>
    %453 = math.exp %452 : vector<8x8xf32>
    %cst_185 = arith.constant dense<0.000000e+00> : vector<8xf32>
    %454 = vector.multi_reduction <add>, %453, %cst_185 [1] : vector<8x8xf32> to vector<8xf32>
    %455 = vector.shape_cast %454 : vector<8xf32> to vector<8x1xf32>
    %456 = tpu.reciprocal %455 {approx = true} : vector<8x1xf32> -> vector<8x1xf32>
    %457 = vector.broadcast %456 : vector<8x1xf32> to vector<8x8xf32>
    %458 = arith.mulf %453, %457 : vector<8x8xf32>
    %cst_186 = arith.constant dense<0.000000e+00> : vector<8x8xf32>
    %459 = tpu.matmul %458, %443, %cst_186 {dimension_numbers = #tpu.dot_dimension_numbers<[1], [0], [0], [1], [0, 0, 1, 1], [], []>} : vector<8x8xf32>, vector<8x8xf32>, vector<8x8xf32> -> vector<8x8xf32>
    %c8_187 = arith.constant 8 : index
    %c24_188 = arith.constant 24 : index
    %460 = vector.load %arg23[%c8_187, %c24_188] : memref<16x32xf32, #tpu.memory_space<vmem>>, vector<8x8xf32>
    tpu.vector_store %arg23[%c8_187, %c24_188], %459 {strides = array<i32>} : memref<16x32xf32, #tpu.memory_space<vmem>>, vector<8x8xf32>,
    %c0_189 = arith.constant 0 : index
    %c0_190 = arith.constant 0 : index
    %461 = vector.load %arg23[%c0_189, %c0_190] : memref<16x32xf32, #tpu.memory_space<vmem>>, vector<16x32xf32>
    %c1_191 = arith.constant 1 : index
    %c0_192 = arith.constant 0 : index
    %c0_193 = arith.constant 0 : index
    %462 = vector.load %arg8[%c1_191, %c0_192, %c0_193] : memref<2x32x32xf32, #tpu.memory_space<vmem>>, vector<1x32x32xf32>
    %463 = vector.shape_cast %462 : vector<1x32x32xf32> to vector<32x32xf32>
    %c1_194 = arith.constant 1 : index
    %c0_195 = arith.constant 0 : index
    %c0_196 = arith.constant 0 : index
    %464 = vector.load %arg9[%c1_194, %c0_195, %c0_196] : memref<2x1x32xf32, #tpu.memory_space<vmem>>, vector<1x1x32xf32>
    %465 = vector.shape_cast %464 : vector<1x1x32xf32> to vector<1x32xf32>
    %cst_197 = arith.constant dense<0.000000e+00> : vector<16x32xf32>
    %466 = tpu.matmul %461, %463, %cst_197 {dimension_numbers = #tpu.dot_dimension_numbers<[1], [0], [0], [1], [0, 0, 1, 1], [], []>} : vector<16x32xf32>, vector<32x32xf32>, vector<16x32xf32> -> vector<16x32xf32>
    %467 = vector.broadcast %465 : vector<1x32xf32> to vector<16x32xf32>
    %468 = arith.addf %466, %467 : vector<16x32xf32>
    %469 = arith.addf %468, %291 : vector<16x32xf32>
    %c1_198 = arith.constant 1 : index
    %c0_199 = arith.constant 0 : index
    %c0_200 = arith.constant 0 : index
    %470 = vector.load %arg10[%c1_198, %c0_199, %c0_200] : memref<2x1x32xf32, #tpu.memory_space<vmem>>, vector<1x1x32xf32>
    %471 = vector.shape_cast %470 : vector<1x1x32xf32> to vector<1x32xf32>
    %c1_201 = arith.constant 1 : index
    %c0_202 = arith.constant 0 : index
    %c0_203 = arith.constant 0 : index
    %472 = vector.load %arg11[%c1_201, %c0_202, %c0_203] : memref<2x1x32xf32, #tpu.memory_space<vmem>>, vector<1x1x32xf32>
    %473 = vector.shape_cast %472 : vector<1x1x32xf32> to vector<1x32xf32>
    %cst_204 = arith.constant dense<0.000000e+00> : vector<16xf32>
    %474 = vector.multi_reduction <add>, %469, %cst_204 [1] : vector<16x32xf32> to vector<16xf32>
    %475 = vector.shape_cast %474 : vector<16xf32> to vector<16x1xf32>
    %cst_205 = arith.constant 3.200000e+01 : f32
    %476 = vector.broadcast %cst_205 : f32 to vector<16x1xf32>
    %477 = arith.divf %475, %476 : vector<16x1xf32>
    %478 = vector.broadcast %477 : vector<16x1xf32> to vector<16x32xf32>
    %479 = arith.subf %469, %478 : vector<16x32xf32>
    %480 = arith.mulf %479, %479 : vector<16x32xf32>
    %cst_206 = arith.constant dense<0.000000e+00> : vector<16xf32>
    %481 = vector.multi_reduction <add>, %480, %cst_206 [1] : vector<16x32xf32> to vector<16xf32>
    %482 = vector.shape_cast %481 : vector<16xf32> to vector<16x1xf32>
    %cst_207 = arith.constant 3.200000e+01 : f32
    %483 = vector.broadcast %cst_207 : f32 to vector<16x1xf32>
    %484 = arith.divf %482, %483 : vector<16x1xf32>
    %cst_208 = arith.constant 9.99999996E-13 : f32
    %485 = vector.broadcast %cst_208 : f32 to vector<16x1xf32>
    %486 = arith.addf %484, %485 : vector<16x1xf32>
    %487 = math.rsqrt %486 : vector<16x1xf32>
    %488 = vector.broadcast %487 : vector<16x1xf32> to vector<16x32xf32>
    %489 = arith.mulf %479, %488 : vector<16x32xf32>
    %490 = vector.broadcast %471 : vector<1x32xf32> to vector<16x32xf32>
    %491 = arith.mulf %489, %490 : vector<16x32xf32>
    %492 = vector.broadcast %473 : vector<1x32xf32> to vector<16x32xf32>
    %493 = arith.addf %491, %492 : vector<16x32xf32>
    %c1_209 = arith.constant 1 : index
    %c0_210 = arith.constant 0 : index
    %c0_211 = arith.constant 0 : index
    %494 = vector.load %arg12[%c1_209, %c0_210, %c0_211] : memref<2x32x64xf32, #tpu.memory_space<vmem>>, vector<1x32x64xf32>
    %495 = vector.shape_cast %494 : vector<1x32x64xf32> to vector<32x64xf32>
    %c1_212 = arith.constant 1 : index
    %c0_213 = arith.constant 0 : index
    %c0_214 = arith.constant 0 : index
    %496 = vector.load %arg13[%c1_212, %c0_213, %c0_214] : memref<2x1x64xf32, #tpu.memory_space<vmem>>, vector<1x1x64xf32>
    %497 = vector.shape_cast %496 : vector<1x1x64xf32> to vector<1x64xf32>
    %cst_215 = arith.constant dense<0.000000e+00> : vector<16x64xf32>
    %498 = tpu.matmul %493, %495, %cst_215 {dimension_numbers = #tpu.dot_dimension_numbers<[1], [0], [0], [1], [0, 0, 1, 1], [], []>} : vector<16x32xf32>, vector<32x64xf32>, vector<16x64xf32> -> vector<16x64xf32>
    %499 = vector.broadcast %497 : vector<1x64xf32> to vector<16x64xf32>
    %500 = arith.addf %498, %499 : vector<16x64xf32>
    %cst_216 = arith.constant 5.000000e-01 : f32
    %501 = vector.broadcast %cst_216 : f32 to vector<16x64xf32>
    %502 = arith.mulf %501, %500 : vector<16x64xf32>
    %cst_217 = arith.constant 4.471500e-02 : f32
    %503 = vector.broadcast %cst_217 : f32 to vector<16x64xf32>
    %504 = arith.mulf %503, %500 : vector<16x64xf32>
    %505 = arith.mulf %504, %500 : vector<16x64xf32>
    %506 = arith.mulf %505, %500 : vector<16x64xf32>
    %507 = arith.addf %500, %506 : vector<16x64xf32>
    %cst_218 = arith.constant 0.797884583 : f32
    %508 = vector.broadcast %cst_218 : f32 to vector<16x64xf32>
    %509 = arith.mulf %508, %507 : vector<16x64xf32>
    %510 = math.tanh %509 : vector<16x64xf32>
    %cst_219 = arith.constant 1.000000e+00 : f32
    %511 = vector.broadcast %cst_219 : f32 to vector<16x64xf32>
    %512 = arith.addf %511, %510 : vector<16x64xf32>
    %513 = arith.mulf %502, %512 : vector<16x64xf32>
    %c1_220 = arith.constant 1 : index
    %c0_221 = arith.constant 0 : index
    %c0_222 = arith.constant 0 : index
    %514 = vector.load %arg14[%c1_220, %c0_221, %c0_222] : memref<2x64x32xf32, #tpu.memory_space<vmem>>, vector<1x64x32xf32>
    %515 = vector.shape_cast %514 : vector<1x64x32xf32> to vector<64x32xf32>
    %c1_223 = arith.constant 1 : index
    %c0_224 = arith.constant 0 : index
    %c0_225 = arith.constant 0 : index
    %516 = vector.load %arg15[%c1_223, %c0_224, %c0_225] : memref<2x1x32xf32, #tpu.memory_space<vmem>>, vector<1x1x32xf32>
    %517 = vector.shape_cast %516 : vector<1x1x32xf32> to vector<1x32xf32>
    %cst_226 = arith.constant dense<0.000000e+00> : vector<16x32xf32>
    %518 = tpu.matmul %513, %515, %cst_226 {dimension_numbers = #tpu.dot_dimension_numbers<[1], [0], [0], [1], [0, 0, 1, 1], [], []>} : vector<16x64xf32>, vector<64x32xf32>, vector<16x32xf32> -> vector<16x32xf32>
    %519 = vector.broadcast %517 : vector<1x32xf32> to vector<16x32xf32>
    %520 = arith.addf %518, %519 : vector<16x32xf32>
    %521 = arith.addf %520, %493 : vector<16x32xf32>
    %c1_227 = arith.constant 1 : index
    %c0_228 = arith.constant 0 : index
    %c0_229 = arith.constant 0 : index
    %522 = vector.load %arg16[%c1_227, %c0_228, %c0_229] : memref<2x1x32xf32, #tpu.memory_space<vmem>>, vector<1x1x32xf32>
    %523 = vector.shape_cast %522 : vector<1x1x32xf32> to vector<1x32xf32>
    %c1_230 = arith.constant 1 : index
    %c0_231 = arith.constant 0 : index
    %c0_232 = arith.constant 0 : index
    %524 = vector.load %arg17[%c1_230, %c0_231, %c0_232] : memref<2x1x32xf32, #tpu.memory_space<vmem>>, vector<1x1x32xf32>
    %525 = vector.shape_cast %524 : vector<1x1x32xf32> to vector<1x32xf32>
    %cst_233 = arith.constant dense<0.000000e+00> : vector<16xf32>
    %526 = vector.multi_reduction <add>, %521, %cst_233 [1] : vector<16x32xf32> to vector<16xf32>
    %527 = vector.shape_cast %526 : vector<16xf32> to vector<16x1xf32>
    %cst_234 = arith.constant 3.200000e+01 : f32
    %528 = vector.broadcast %cst_234 : f32 to vector<16x1xf32>
    %529 = arith.divf %527, %528 : vector<16x1xf32>
    %530 = vector.broadcast %529 : vector<16x1xf32> to vector<16x32xf32>
    %531 = arith.subf %521, %530 : vector<16x32xf32>
    %532 = arith.mulf %531, %531 : vector<16x32xf32>
    %cst_235 = arith.constant dense<0.000000e+00> : vector<16xf32>
    %533 = vector.multi_reduction <add>, %532, %cst_235 [1] : vector<16x32xf32> to vector<16xf32>
    %534 = vector.shape_cast %533 : vector<16xf32> to vector<16x1xf32>
    %cst_236 = arith.constant 3.200000e+01 : f32
    %535 = vector.broadcast %cst_236 : f32 to vector<16x1xf32>
    %536 = arith.divf %534, %535 : vector<16x1xf32>
    %cst_237 = arith.constant 9.99999996E-13 : f32
    %537 = vector.broadcast %cst_237 : f32 to vector<16x1xf32>
    %538 = arith.addf %536, %537 : vector<16x1xf32>
    %539 = math.rsqrt %538 : vector<16x1xf32>
    %540 = vector.broadcast %539 : vector<16x1xf32> to vector<16x32xf32>
    %541 = arith.mulf %531, %540 : vector<16x32xf32>
    %542 = vector.broadcast %523 : vector<1x32xf32> to vector<16x32xf32>
    %543 = arith.mulf %541, %542 : vector<16x32xf32>
    %544 = vector.broadcast %525 : vector<1x32xf32> to vector<16x32xf32>
    %545 = arith.addf %543, %544 : vector<16x32xf32>
    %546 = vector.extract_strided_slice %545 {offsets = [0, 0], sizes = [1, 32], strides = [1, 1]} : vector<16x32xf32> to vector<1x32xf32>
    %547 = vector.extract_strided_slice %545 {offsets = [8, 0], sizes = [1, 32], strides = [1, 1]} : vector<16x32xf32> to vector<1x32xf32>
    %548 = tpu.concatenate %546, %547 in 0 : vector<1x32xf32>, vector<1x32xf32> -> vector<2x32xf32>
    %c0_238 = arith.constant 0 : index
    %c0_239 = arith.constant 0 : index
    %549 = vector.load %arg18[%c0_238, %c0_239] : memref<32x32xf32, #tpu.memory_space<vmem>>, vector<32x32xf32>
    %c0_240 = arith.constant 0 : index
    %c0_241 = arith.constant 0 : index
    %550 = vector.load %arg19[%c0_240, %c0_241] : memref<1x32xf32, #tpu.memory_space<vmem>>, vector<1x32xf32>
    %cst_242 = arith.constant dense<0.000000e+00> : vector<2x32xf32>
    %551 = tpu.matmul %548, %549, %cst_242 {dimension_numbers = #tpu.dot_dimension_numbers<[1], [0], [0], [1], [0, 0, 1, 1], [], []>} : vector<2x32xf32>, vector<32x32xf32>, vector<2x32xf32> -> vector<2x32xf32>
    %552 = vector.broadcast %550 : vector<1x32xf32> to vector<2x32xf32>
    %553 = arith.addf %551, %552 : vector<2x32xf32>
    %554 = math.tanh %553 : vector<2x32xf32>
    %c0_243 = arith.constant 0 : index
    %c0_244 = arith.constant 0 : index
    %555 = vector.load %arg20[%c0_243, %c0_244] : memref<32x2xf32, #tpu.memory_space<vmem>>, vector<32x2xf32>
    %c0_245 = arith.constant 0 : index
    %c0_246 = arith.constant 0 : index
    %556 = vector.load %arg21[%c0_245, %c0_246] : memref<1x2xf32, #tpu.memory_space<vmem>>, vector<1x2xf32>
    %cst_247 = arith.constant dense<0.000000e+00> : vector<2x2xf32>
    %557 = tpu.matmul %554, %555, %cst_247 {dimension_numbers = #tpu.dot_dimension_numbers<[1], [0], [0], [1], [0, 0, 1, 1], [], []>} : vector<2x32xf32>, vector<32x2xf32>, vector<2x2xf32> -> vector<2x2xf32>
    %558 = vector.broadcast %556 : vector<1x2xf32> to vector<2x2xf32>
    %559 = arith.addf %557, %558 : vector<2x2xf32>
    %c0_248 = arith.constant 0 : index
    %c0_249 = arith.constant 0 : index
    %560 = vector.load %arg22[%c0_248, %c0_249] : memref<2x2xf32, #tpu.memory_space<vmem>>, vector<2x2xf32>
    tpu.vector_store %arg22[%c0_248, %c0_249], %559 {strides = array<i32>} : memref<2x2xf32, #tpu.memory_space<vmem>>, vector<2x2xf32>,
    return
  }
}

</mosaic_0001>

<bundles_post_ra>
// kernel: bert_classifier_forward.1
= control target key start
LH: loop header
LB: loop body
LE: loop exit
PB: predicated region body
PF: predicated region fallthrough
CT: control target
= control target key end

     0   :  { %s3005_s0 = inlined_call_operand.vmem [shape: s32[16,1], index: 0, kind: input, shape index: {}]   ;;  %s3006_s1 = inlined_call_operand.vmem [shape: s32[2,8], index: 1, kind: input, shape index: {}]   ;;  %s3007_s2 = inlined_call_operand.vmem [shape: f32[16,32], index: 2, kind: input, shape index: {}]   ;;  %s3008_s3 = inlined_call_operand.vmem [shape: f32[64,32], index: 3, kind: input, shape index: {}]   ;;  %s3009_s4 = inlined_call_operand.vmem [shape: f32[1,32], index: 4, kind: input, shape index: {}]   ;;  %s3010_s5 = inlined_call_operand.vmem [shape: f32[1,32], index: 5, kind: input, shape index: {}]   ;;  %s3011_s6 = inlined_call_operand.vmem [shape: f32[2,32,96], index: 6, kind: input, shape index: {}]   ;;  %s3012_s7 = inlined_call_operand.vmem [shape: f32[2,1,96], index: 7, kind: input, shape index: {}]   ;;  %s3013_s8 = inlined_call_operand.vmem [shape: f32[2,32,32], index: 8, kind: input, shape index: {}]   ;;  %s3014_s9 = inlined_call_operand.vmem [shape: f32[2,1,32], index: 9, kind: input, shape index: {}]   ;;  %s3015_s10 = inlined_call_operand.vmem [shape: f32[2,1,32], index: 10, kind: input, shape index: {}]   ;;  %s3016_s11 = inlined_call_operand.vmem [shape: f32[2,1,32], index: 11, kind: input, shape index: {}]   ;;  %s3017_s12 = inlined_call_operand.vmem [shape: f32[2,32,64], index: 12, kind: input, shape index: {}]   ;;  %s3018_s13 = inlined_call_operand.vmem [shape: f32[2,1,64], index: 13, kind: input, shape index: {}]   ;;  %s3019_s14 = inlined_call_operand.vmem [shape: f32[2,64,32], index: 14, kind: input, shape index: {}]   ;;  %s3020_s15 = inlined_call_operand.vmem [shape: f32[2,1,32], index: 15, kind: input, shape index: {}]   ;;  %s3021_s16 = inlined_call_operand.vmem [shape: f32[2,1,32], index: 16, kind: input, shape index: {}]   ;;  %s3022_s17 = inlined_call_operand.vmem [shape: f32[2,1,32], index: 17, kind: input, shape index: {}]   ;;  %s3023_s18 = inlined_call_operand.vmem [shape: f32[32,32], index: 18, kind: input, shape index: {}]   ;;  %s3024_s19 = inlined_call_operand.vmem [shape: f32[1,32], index: 19, kind: input, shape index: {}]   ;;  %s3025_s20 = inlined_call_operand.vmem [shape: f32[32,2], index: 20, kind: input, shape index: {}]   ;;  %s3026_s21 = inlined_call_operand.vmem [shape: f32[1,2], index: 21, kind: input, shape index: {}]   ;;  %s3027_s22 = inlined_call_operand.hbm [shape: f32[2,2], index: 22, kind: output, shape index: {}]  }
   0x1   :  { %3051 = sst [smem:[#allocation6_spill]] %s3005_s0 }
   0x2   :  { %3052 = sst [smem:[#allocation7_spill]] %s3006_s1 }
   0x3   :  { %3053 = sst [smem:[#allocation8_spill]] %s3007_s2 }
   0x4   :  { %3054 = sst [smem:[#allocation9_spill]] %s3008_s3 }
   0x5   :  { %3055 = sst [smem:[#allocation10_spill]] %s3009_s4 }
   0x6   :  { %3056 = sst [smem:[#allocation11_spill]] %s3010_s5 }
   0x7   :  { %3057 = sst [smem:[#allocation12_spill]] %s3011_s6 }
   0x8   :  { %s3058_s29 = sld [smem:[#allocation6_spill]]  ;;  %v2273_v3 = vmov 0  }
   0x9   :  { %s3059_s1 = sld [smem:[#allocation9_spill]]  ;;  %2124 = vset.pattern.permute.xlu0 %v2273_v3  ;;  %2125 = vset.pattern.permute.xlu1 %v2273_v3 }
   0xe   :  { %v72_v0 = vld [vmem:[%s3058_s29] sm:$0xff]  ;;  %v73_v1 = vld [vmem:[%s3058_s29 + $0x8] sm:$0xff] }
   0xf   :  { %v95_v2 = vld [vmem:[%s3059_s1 + $0x38] sm:$0xff]  ;;  %77 = vperm.xlu0 %2124, %v72_v0   ;;  %80 = vperm.xlu1 %2125, %v73_v1   ;;  %v94_v4 = vld [vmem:[%s3059_s1 + $0x30] sm:$0xff]  ;;  %v93_v5 = vld [vmem:[%s3059_s1 + $0x28] sm:$0xff] }
  0x10   :  { %113 = vmatpush.msra.mxu0 %v95_v2  ;;  %v92_v6 = vld [vmem:[%s3059_s1 + $0x20] sm:$0xff]  ;;  %v91_v7 = vld [vmem:[%s3059_s1 + $0x18] sm:$0xff] }
  0x12   :  { %114 = vmatpush.msra.mxu0 %v94_v4 }
  0x14   :  { %115 = vmatpush.msra.mxu0 %v93_v5 }
  0x16   :  { %116 = vmatpush.msra.mxu0 %v92_v6 }
  0x17   :  { %27 = vsyncpa [#allocation4], 0  ;;  %v90_v8 = vld [vmem:[%s3059_s1 + $0x10] sm:$0xff]  ;;  %v89_v9 = vld [vmem:[%s3059_s1 + $0x8] sm:$0xff]  ;;  %v74_v11 = vlaneseq  ;;  %vm98_vm0 = vcmask 523264   ;;  %v2274_v14 = vmov 0.0  }
  0x18   :  { %117 = vmatpush.msra.mxu0 %v91_v7  ;;  %v88_v10 = vld [vmem:[%s3059_s1] sm:$0xff]  ;;  %s3060_s6 = sld [smem:[#allocation8_spill]]  ;;  %vm130_vm3 = vcmask 261120   ;;  %v2275_v26 = vmov 32.0   ;;  %s3036_s3 = smov 72   ;;  %vm236_vm11 = vcmask 64512  }
  0x19   :  { %v75_v12 = vand.u32 127, %v74_v11  ;;  %2151 = vrcp.f32 %v2275_v26  ;;  %s3061_s27 = sld [smem:[#allocation12_spill]]  ;;  %v2133_v11 = vld [vmem:[%s3012_s7] ss:$0 sm:$0xff]  ;;  %s3032_s28 = smov 112   ;;  %vm373_vm12 = vcmask 130112  }
  0x1a   :  { %118 = vmatpush.msra.mxu0 %v90_v8  ;;  %s3062_s24 = sld [smem:[#allocation10_spill]]  ;;  %s2278_s29 = smov 88   ;;  %vm446_vm13 = vcmask 195712   ;;  %vm519_vm14 = vcmask 261312  }
  0x1b   :  { %s3063_s25 = sld [smem:[#allocation11_spill]]  ;;  %s3045_s30 = smov 48  }
  0x1c   :  { %119 = vmatpush.msra.mxu0 %v89_v9  ;;  %s3044_s4 = smov 56   ;;  %s3038_s0 = smov 120  }
  0x1d   :  { %s3042_s23 = smov 96   ;;  %s3034_s5 = smov 80  }
  0x1e   :  { %120 = vmatpush.msra.mxu0 %v88_v10  ;;  %v96_v18 = vld [vmem:[%s3060_s6] sm:$0xff]  ;;  %v97_v22 = vld [vmem:[%s3060_s6 + $0x8] sm:$0xff]  ;;  %s2285_s6 = smov 40   ;;  %s3064_s26 = sld [smem:[#allocation7_spill]] }
  0x1f   :  { %v2152_v27 = vpop.eup %2151  ;;  %v199_v43 = vld [vmem:[%s3061_s27 + $0x18] sm:$0xff]  ;;  %v198_v44 = vld [vmem:[%s3061_s27 + $0x10] sm:$0xff]  ;;  %v197_v45 = vld [vmem:[%s3061_s27 + $0x8] sm:$0xff]  ;;  %s2286_s2 = smov 64   ;;  %s3047_s1 = smov 24  }
  0x20   :  { %v138_v28 = vmul.f32 32.0, %v2152_v27  ;;  %vm142_vm4 = vweird.f32 %v2152_v27  ;;  %222 = vmatpush.msra.mxu1 %v199_v43  ;;  %v196_v46 = vld [vmem:[%s3061_s27] sm:$0xff] }
  0x21   :  { %v2131_v61 = vld [vmem:[%s3062_s24] ss:$0 sm:$0xff]  ;;  %s3040_s24 = smov 104  }
  0x22   :  { %v139_v29 = vsub.f32 1.0, %v138_v28  ;;  %223 = vmatpush.msra.mxu1 %v198_v44  ;;  %v2132_v1 = vld [vmem:[%s3063_s25] ss:$0 sm:$0xff]  ;;  %s2288_s25 = smov 8  }
  0x24   :  { %v140_v30 = vmul.f32 %v2152_v27, %v139_v29  ;;  %224 = vmatpush.msra.mxu1 %v197_v45  ;;  %v192_v26 = vld [vmem:[%s3064_s26] sm:$0x3]  ;;  %s3049_s26 = smov 16  }
  0x26   :  { %v141_v31 = vadd.f32 %v2152_v27, %v140_v30  ;;  %225 = vmatpush.msra.mxu1 %v196_v46 }
  0x28   :  { %v2446_v32 = vsel %vm142_vm4, %v2152_v27, %v141_v31  ;;  %v193_v27 = vcvt.s32.f32 %v192_v26 }
  0x2a   :  { %v194_v28 = vsub.f32 1.0, %v193_v27 }
  0x2c   :  { %v2521_v29 = vmul.f32 -10000.0, %v194_v28 }
  0x2e   :  { %v2524_v30 = vperm.slane %v2521_v29, 0 }
  0x81   :  { %v78_v13 = vpop.permute.xlu0 %77  ;;  %v81_v16 = vpop.permute.xlu1 %80 }
  0x82   :  { %vm82_vm1 = vcmp.eq.s32.totalorder %v75_v12, %v78_v13  ;;  %vm83_vm2 = vcmp.eq.s32.totalorder %v75_v12, %v81_v16 }
  0x83   :  { %v2008_v15 = vsel %vm82_vm1, 1.0, %v2274_v14  ;;  %v2009_v17 = vsel %vm83_vm2, 1.0, %v2274_v14 }
  0x84   :  { %2010 = vmatmul.msk.f32.vlgmr.msra.gmra.mxu0 %vm98_vm0, %v2008_v15 }
  0x8c   :  { %2011 = vmatmul.msk.f32.gmra.mxu0 %vm98_vm0, %v2009_v17 }
 0x101   :  { %v122_v19 = vpop.f32.mrf.mxu0 }
 0x102   :  { %v123_v20 = vadd.f32 %v122_v19, %v96_v18 }
 0x104   :  { %v131_v21 = vsel %vm130_vm3, %v123_v20, 0.0 }
 0x105   :  { %132 = vadd.xlane.f32.xlu0 %v131_v21 }
 0x109   :  { %v125_v23 = vpop.f32.mrf.mxu0 }
 0x10a   :  { %v126_v24 = vadd.f32 %v125_v23, %v97_v22 }
 0x10c   :  { %v134_v25 = vsel %vm130_vm3, %v126_v24, 0.0 }
 0x10d   :  { %135 = vadd.xlane.f32.xlu2 %v134_v25 }
 0x178   :  { %v133_v33 = vpop.xlane.xlu0 %132 }
 0x179   :  { %v144_v34 = vmul.f32 %v2446_v32, %v133_v33 }
 0x17b   :  { %v146_v35 = vsub.f32 %v123_v20, %v144_v34 }
 0x17d   :  { %v148_v36 = vmul.f32 %v146_v35, %v146_v35 }
 0x17f   :  { %v150_v37 = vsel %vm130_vm3, %v148_v36, 0.0 }
 0x180   :  { %v136_v38 = vpop.xlane.xlu2 %135  ;;  %151 = vadd.xlane.f32.xlu1 %v150_v37 }
 0x181   :  { %v145_v39 = vmul.f32 %v2446_v32, %v136_v38 }
 0x183   :  { %v147_v40 = vsub.f32 %v126_v24, %v145_v39 }
 0x185   :  { %v149_v41 = vmul.f32 %v147_v40, %v147_v40 }
 0x187   :  { %v153_v42 = vsel %vm130_vm3, %v149_v41, 0.0 }
 0x188   :  { %154 = vadd.xlane.f32.xlu2 %v153_v42 }
 0x1f3   :  { %v152_v47 = vpop.xlane.xlu1 %151 }
 0x1f4   :  { %v156_v48 = vmul.f32 %v152_v47, %v2446_v32 }
 0x1f6   :  { %v158_v49 = vadd.f32 1e-12, %v156_v48 }
 0x1f8   :  { %2153 = vrsqrt.f32 %v158_v49  ;;  %vm166_vm6 = vweird.f32 %v158_v49 }
 0x1fb   :  { %v155_v50 = vpop.xlane.xlu2 %154 }
 0x1fc   :  { %v157_v51 = vmul.f32 %v155_v50, %v2446_v32 }
 0x1fe   :  { %v2154_v52 = vpop.eup %2153  ;;  %v159_v53 = vadd.f32 1e-12, %v157_v51 }
 0x1ff   :  { %v161_v54 = vmul.f32 %v2154_v52, %v158_v49  ;;  %vm167_vm5 = vweird.f32 %v2154_v52 }
 0x200   :  { %2155 = vrsqrt.f32 %v159_v53  ;;  %vm168_vm7 = vmor %vm166_vm6, %vm167_vm5  ;;  %vm176_vm8 = vweird.f32 %v159_v53 }
 0x201   :  { %v162_v55 = vmul.f32 %v2154_v52, %v161_v54 }
 0x203   :  { %v163_v56 = vmul.f32 0.5, %v162_v55 }
 0x205   :  { %v164_v57 = vsub.f32 1.5, %v163_v56 }
 0x206   :  { %v2156_v58 = vpop.eup %2155 }
 0x207   :  { %v165_v59 = vmul.f32 %v2154_v52, %v164_v57  ;;  %v171_v60 = vmul.f32 %v2156_v58, %v159_v53  ;;  %vm177_vm9 = vweird.f32 %v2156_v58 }
 0x208   :  { %vm178_vm10 = vmor %vm176_vm8, %vm177_vm9 }
 0x209   :  { %v169_v62 = vsel %vm168_vm7, %v2154_v52, %v165_v59  ;;  %v172_v63 = vmul.f32 %v2156_v58, %v171_v60 }
 0x20a   :  { %v180_v0 = vmul.f32 %v169_v62, %v146_v35 }
 0x20b   :  { %v173_v2 = vmul.f32 0.5, %v172_v63 }
 0x20c   :  { %v185_v3 = vmul.f32 %v2131_v61, %v180_v0 }
 0x20d   :  { %v174_v4 = vsub.f32 1.5, %v173_v2 }
 0x20e   :  { %v2472_v5 = vadd.f32 %v2132_v1, %v185_v3 }
 0x20f   :  { %v175_v6 = vmul.f32 %v2156_v58, %v174_v4 }
 0x210   :  { %2012 = vmatmul.msk.f32.vlgmr.msra.gmra.mxu1 %vm130_vm3, %v2472_v5 }
 0x211   :  { %v179_v7 = vsel %vm178_vm10, %v2156_v58, %v175_v6 }
 0x212   :  { %v181_v8 = vmul.f32 %v179_v7, %v147_v40 }
 0x214   :  { %v186_v9 = vmul.f32 %v2131_v61, %v181_v8 }
 0x216   :  { %v2476_v10 = vadd.f32 %v2132_v1, %v186_v9 }
 0x218   :  { %2013 = vmatmul.msk.f32.gmra.mxu1 %vm130_vm3, %v2476_v10 }
 0x28d   :  { %v227_v12 = vpop.f32.mrf.mxu1 }
 0x28e   :  { %v2483_v13 = vadd.f32 %v2133_v11, %v227_v12 }
 0x290   :  { %450 = vrot.lane.b32.xlu1 %v2483_v13, %s3036_s3  ;;  %375 = vrot.lane.b32.xlu0 %v2483_v13, %s3032_s28 }
 0x291   :  { %304 = vrot.lane.b32.xlu2 %v2483_v13, %s2278_s29 }
 0x295   :  { %v230_v14 = vpop.f32.mrf.mxu1 }
 0x296   :  { %v2497_v15 = vadd.f32 %v2133_v11, %v230_v14 }
 0x298   :  { %416 = vrot.lane.b32.xlu1 %v2483_v13, %s3045_s30  ;;  %343 = vrot.lane.b32.xlu0 %v2483_v13, %s3044_s4 }
 0x299   :  { %302 = vrot.lane.b32.xlu2 %v2483_v13, %s3038_s0 }
 0x2a0   :  { %522 = vrot.lane.b32.xlu0 %v2497_v15, %s3042_s23 }
 0x2a1   :  { %377 = vrot.lane.b32.xlu2 %v2483_v13, %s3034_s5 }
 0x2a9   :  { %448 = vrot.lane.b32.xlu2 %v2483_v13, %s3040_s24 }
 0x2b1   :  { %234 = vrot.lane.b32.xlu2 %v2483_v13, %s3042_s23  ;;  %s2290_s23 = smov [#allocation3]  }
 0x2b9   :  { %489 = vrot.lane.b32.xlu2 %v2483_v13, %s2285_s6 }
 0x2eb   :  { %v305_v16 = vpop.permute.xlu2 %304 }
 0x2ec   :  { %2017 = vmatpush.xpose.msk.msra.mxu3 %vm236_vm11, %v305_v16 }
 0x2f3   :  { %v303_v17 = vpop.permute.xlu2 %302 }
 0x2f4   :  { %2018 = vmatmul.msk.f32.vlgmr.msra.gmra.mxu3 %vm236_vm11, %v303_v17 }
 0x2fb   :  { %v378_v18 = vpop.permute.xlu2 %377 }
 0x2fc   :  { %2020 = vmatpush.xpose.msk.msrb.mxu3 %vm236_vm11, %v378_v18 }
 0x302   :  { %v451_v19 = vpop.permute.xlu1 %450  ;;  %v376_v20 = vpop.permute.xlu0 %375 }
 0x303   :  { %v449_v21 = vpop.permute.xlu2 %448  ;;  %2021 = vmatmul.msk.f32.vlgmr.msrb.gmra.mxu3 %vm236_vm11, %v376_v20  ;;  %2023 = vmatpush.xpose.msk.msrb.mxu1 %vm236_vm11, %v451_v19 }
 0x306   :  { %2024 = vmatmul.msk.f32.vlgmr.msrb.gmra.mxu1 %vm236_vm11, %v449_v21 }
 0x30a   :  { %v344_v22 = vpop.permute.xlu0 %343  ;;  %v417_v24 = vpop.permute.xlu1 %416 }
 0x30b   :  { %v235_v23 = vpop.permute.xlu2 %234 }
 0x30c   :  { %2014 = vmatpush.xpose.msk.msra.mxu2 %vm236_vm11, %v235_v23 }
 0x30f   :  { %2015 = vmatmul.msk.f32.vlgmr.msra.gmra.mxu2 %vm236_vm11, %v2483_v13 }
 0x310   :  { %364 = vmatpush.msrb.mxu2 %v344_v22 }
 0x312   :  { %437 = vmatpush.msra.mxu2 %v417_v24  ;;  %v523_v48 = vpop.permute.xlu0 %522 }
 0x313   :  { %v490_v25 = vpop.permute.xlu2 %489 }
 0x314   :  { %510 = vmatpush.msra.mxu3 %v490_v25 }
 0x377   :  { %v327_v31 = vpop.f32.mrf.mxu3 }
 0x378   :  { %v330_v33 = vmul.f32 0.35355338, %v327_v31 }
 0x37a   :  { %v331_v34 = vadd.f32 %v330_v33, %v2524_v30 }
 0x37c   :  { %v332_v35 = vsel %vm236_vm11, %v331_v34, -inf }
 0x37d   :  { %333 = vmax.xlane.f32.xlu0 %v332_v35 }
 0x383   :  { %v473_v36 = vpop.f32.mrf.mxu1 }
 0x384   :  { %v476_v37 = vmul.f32 0.35355338, %v473_v36 }
 0x386   :  { %v477_v38 = vadd.f32 %v476_v37, %v2524_v30  ;;  %v400_v42 = vpop.f32.mrf.mxu3 }
 0x387   :  { %v403_v44 = vmul.f32 0.35355338, %v400_v42 }
 0x388   :  { %v478_v39 = vsel %vm236_vm11, %v477_v38, -inf }
 0x389   :  { %479 = vmax.xlane.f32.xlu1 %v478_v39  ;;  %v404_v46 = vadd.f32 %v403_v44, %v2524_v30 }
 0x38b   :  { %v405_v47 = vsel %vm236_vm11, %v404_v46, -inf }
 0x391   :  { %591 = vrot.lane.b32.xlu0 %v2497_v15, %s2278_s29 }
 0x392   :  { %v258_v40 = vpop.f32.mrf.mxu2 }
 0x393   :  { %v261_v41 = vmul.f32 0.35355338, %v258_v40 }
 0x395   :  { %v263_v43 = vadd.f32 %v2524_v30, %v261_v41 }
 0x397   :  { %v264_v45 = vsel %vm236_vm11, %v263_v43, -inf }
 0x398   :  { %265 = vmax.xlane.f32.xlu2 %v264_v45 }
 0x3a0   :  { %406 = vmax.xlane.f32.xlu2 %v405_v47 }
 0x3a2   :  { %589 = vrot.lane.b32.xlu1 %v2497_v15, %s3038_s0  ;;  %s3069_s0 = smov 80  }
 0x3b8   :  { %663 = vrot.lane.b32.xlu2 %v2497_v15, %s3034_s5 }
 0x3f0   :  { %v334_v49 = vpop.xlane.xlu0 %333 }
 0x3f1   :  { %v335_v50 = vsub.f32 %v331_v34, %v334_v49 }
 0x3f3   :  { %v336_v51 = vmul.f32 1.442695, %v335_v50 }
 0x3f5   :  { %2157 = vpow2.f32 %v336_v51 }
 0x3fb   :  { %v2158_v52 = vpop.eup %2157 }
 0x3fc   :  { %v338_v53 = vsel %vm236_vm11, %v2158_v52, 0.0  ;;  %v480_v54 = vpop.xlane.xlu1 %479 }
 0x3fd   :  { %339 = vadd.xlane.f32.xlu0 %v338_v53  ;;  %v481_v55 = vsub.f32 %v477_v38, %v480_v54 }
 0x3ff   :  { %v482_v56 = vmul.f32 1.442695, %v481_v55 }
 0x401   :  { %2159 = vpow2.f32 %v482_v56 }
 0x403   :  { %v592_v57 = vpop.permute.xlu0 %591 }
 0x404   :  { %2029 = vmatpush.xpose.msk.msra.mxu1 %vm236_vm11, %v592_v57  ;;  %v810_v57 = vld [vmem:[%s3013_s8 + $0x18] sm:$0xff] }
 0x407   :  { %v2160_v58 = vpop.eup %2159 }
 0x408   :  { %v484_v59 = vsel %vm236_vm11, %v2160_v58, 0.0 }
 0x409   :  { %485 = vadd.xlane.f32.xlu2 %v484_v59  ;;  %v808_v59 = vld [vmem:[%s3013_s8 + $0x8] sm:$0xff] }
 0x40b   :  { %v266_v60 = vpop.xlane.xlu2 %265 }
 0x40c   :  { %v267_v3 = vsub.f32 %v263_v43, %v266_v60  ;;  %v807_v60 = vld [vmem:[%s3013_s8] sm:$0xff] }
 0x40e   :  { %v268_v4 = vmul.f32 1.442695, %v267_v3 }
 0x411   :  { %735 = vrot.lane.b32.xlu0 %v2497_v15, %s3036_s3 }
 0x413   :  { %v407_v61 = vpop.xlane.xlu2 %406 }
 0x414   :  { %v408_v62 = vsub.f32 %v404_v46, %v407_v61  ;;  %v590_v63 = vpop.permute.xlu1 %589 }
 0x415   :  { %2030 = vmatmul.msk.f32.vlgmr.msra.gmra.mxu1 %vm236_vm11, %v590_v63 }
 0x416   :  { %v409_v0 = vmul.f32 1.442695, %v408_v62 }
 0x418   :  { %2161 = vpow2.f32 %v409_v0 }
 0x419   :  { %2163 = vpow2.f32 %v268_v4 }
 0x41b   :  { %v664_v9 = vpop.permute.xlu2 %663 }
 0x41e   :  { %v2162_v1 = vpop.eup %2161 }
 0x41f   :  { %v411_v2 = vsel %vm236_vm11, %v2162_v1, 0.0  ;;  %v2164_v6 = vpop.eup %2163 }
 0x420   :  { %412 = vadd.xlane.f32.xlu1 %v411_v2  ;;  %v270_v7 = vsel %vm236_vm11, %v2164_v6, 0.0 }
 0x421   :  { %733 = vrot.lane.b32.xlu2 %v2497_v15, %s3040_s24 }
 0x439   :  { %661 = vrot.lane.b32.xlu1 %v2497_v15, %s3032_s28  ;;  %s3065_s28 = smov 96  }
 0x43b   :  { %271 = vadd.xlane.f32.xlu0 %v270_v7 }
 0x441   :  { %275 = vrot.lane.b32.xlu1 %v2483_v13, %s2286_s2  ;;  %v2560_v13 = vperm.slane %v2521_v29, 1 }
 0x470   :  { %v340_v8 = vpop.xlane.xlu0 %339 }
 0x471   :  { %2165 = vrcp.f32 %v340_v8 }
 0x477   :  { %v2166_v11 = vpop.eup %2165 }
 0x478   :  { %v342_v12 = vmul.f32 %v2166_v11, %v2158_v52 }
 0x47a   :  { %2019 = vmatmul.msk.f32.vlgmr.msrb.gmra.mxu2 %vm236_vm11, %v342_v12 }
 0x47b   :  { %2026 = vmatpush.xpose.msk.msrb.mxu2 %vm236_vm11, %v523_v48 }
 0x47c   :  { %v486_v14 = vpop.xlane.xlu2 %485 }
 0x47d   :  { %2167 = vrcp.f32 %v486_v14 }
 0x483   :  { %v2168_v16 = vpop.eup %2167  ;;  %v736_v17 = vpop.permute.xlu0 %735 }
 0x484   :  { %v488_v18 = vmul.f32 %v2168_v16, %v2160_v58  ;;  %2035 = vmatpush.xpose.msk.msrb.mxu1 %vm236_vm11, %v736_v17  ;;  %v734_v19 = vpop.permute.xlu2 %733  ;;  %v809_v58 = vld [vmem:[%s3013_s8 + $0x10] sm:$0xff] }
 0x486   :  { %2025 = vmatmul.msk.f32.vlgmr.msra.gmra.mxu3 %vm236_vm11, %v488_v18 }
 0x487   :  { %2036 = vmatmul.msk.f32.vlgmr.msrb.gmra.mxu1 %vm236_vm11, %v734_v19 }
 0x492   :  { %v614_v20 = vpop.f32.mrf.mxu1 }
 0x493   :  { %v617_v21 = vmul.f32 0.35355338, %v614_v20  ;;  %v413_v22 = vpop.xlane.xlu1 %412 }
 0x494   :  { %2169 = vrcp.f32 %v413_v22 }
 0x495   :  { %v618_v23 = vadd.f32 %v617_v21, %v2560_v13 }
 0x497   :  { %v619_v24 = vsel %vm236_vm11, %v618_v23, -inf }
 0x498   :  { %620 = vmax.xlane.f32.xlu1 %v619_v24 }
 0x49a   :  { %v2170_v25 = vpop.eup %2169 }
 0x49b   :  { %v415_v26 = vmul.f32 %v2170_v25, %v2162_v1  ;;  %v2612_v25 = vld [vmem:[%s3014_s9] ss:$0 sm:$0xff] }
 0x49d   :  { %2022 = vmatmul.msk.f32.vlgmr.msra.gmra.mxu2 %vm236_vm11, %v415_v26 }
 0x49e   :  { %2032 = vmatpush.xpose.msk.msra.mxu2 %vm236_vm11, %v664_v9 }
 0x4a5   :  { %2027 = vmatmul.msk.f32.vlgmr.msrb.gmra.mxu2 %vm236_vm11, %v2497_v15 }
 0x4a6   :  { %833 = vmatpush.msrb.mxu2 %v810_v57 }
 0x4a8   :  { %834 = vmatpush.msrb.mxu2 %v809_v58 }
 0x4aa   :  { %835 = vmatpush.msrb.mxu2 %v808_v59 }
 0x4ab   :  { %v662_v27 = vpop.permute.xlu1 %661 }
 0x4ac   :  { %836 = vmatpush.msrb.mxu2 %v807_v60 }
 0x4ad   :  { %2033 = vmatmul.msk.f32.vlgmr.msra.gmra.mxu2 %vm236_vm11, %v662_v27 }
 0x4ae   :  { %v272_v28 = vpop.xlane.xlu0 %271 }
 0x4af   :  { %2171 = vrcp.f32 %v272_v28 }
 0x4b3   :  { %v276_v29 = vpop.permute.xlu1 %275 }
 0x4b4   :  { %296 = vmatpush.msrb.mxu0 %v276_v29 }
 0x4b5   :  { %v2172_v31 = vpop.eup %2171 }
 0x4b6   :  { %v274_v33 = vmul.f32 %v2172_v31, %v2164_v6 }
 0x4b8   :  { %2016 = vmatmul.msk.f32.vlgmr.msrb.gmra.mxu0 %vm236_vm11, %v274_v33 }
 0x4fd   :  { %v366_v39 = vpop.f32.mrf.mxu2 }
 0x504   :  { %v758_v34 = vpop.f32.mrf.mxu1 }
 0x505   :  { %v761_v35 = vmul.f32 0.35355338, %v758_v34 }
 0x507   :  { %v762_v36 = vadd.f32 %v761_v35, %v2560_v13 }
 0x509   :  { %v512_v37 = vpop.f32.mrf.mxu3  ;;  %v763_v38 = vsel %vm236_vm11, %v762_v36, -inf }
 0x50a   :  { %764 = vmax.xlane.f32.xlu0 %v763_v38  ;;  %516 = vrot.lane.b32.xlu2 %v512_v37, %s3047_s1 }
 0x50b   :  { %v621_v42 = vpop.xlane.xlu1 %620 }
 0x50c   :  { %v622_v43 = vsub.f32 %v618_v23, %v621_v42 }
 0x50e   :  { %v623_v44 = vmul.f32 1.442695, %v622_v43 }
 0x510   :  { %2173 = vpow2.f32 %v623_v44 }
 0x512   :  { %370 = vrot.lane.b32.xlu2 %v366_v39, %s2288_s25 }
 0x516   :  { %v2174_v52 = vpop.eup %2173 }
 0x517   :  { %v625_v54 = vsel %vm236_vm11, %v2174_v52, 0.0 }
 0x520   :  { %v439_v40 = vpop.f32.mrf.mxu2 }
 0x521   :  { %443 = vrot.lane.b32.xlu1 %v439_v40, %s3049_s26 }
 0x528   :  { %v545_v41 = vpop.f32.mrf.mxu2 }
 0x529   :  { %v548_v47 = vmul.f32 0.35355338, %v545_v41 }
 0x52b   :  { %v550_v51 = vadd.f32 %v2560_v13, %v548_v47 }
 0x52d   :  { %v551_v53 = vsel %vm236_vm11, %v550_v51, -inf }
 0x530   :  { %v686_v45 = vpop.f32.mrf.mxu2 }
 0x531   :  { %v689_v46 = vmul.f32 0.35355338, %v686_v45 }
 0x533   :  { %v690_v48 = vadd.f32 %v689_v46, %v2560_v13 }
 0x535   :  { %v298_v49 = vpop.f32.mrf.mxu0  ;;  %v691_v50 = vsel %vm236_vm11, %v690_v48, -inf }
 0x536   :  { %301 = vst.msk [vmem:[#allocation2] sm:$0xff] %vm236_vm11, %v298_v49  ;;  %692 = vmax.xlane.f32.xlu0 %v691_v50  ;;  %v905_v49 = vld [vmem:[%s3017_s12 + $0x18] sm:$0xff]  ;;  %v904_v50 = vld [vmem:[%s3017_s12 + $0x10] sm:$0xff] }
 0x53b   :  { %552 = vmax.xlane.f32.xlu2 %v551_v53 }
 0x53e   :  { %626 = vadd.xlane.f32.xlu0 %v625_v54 }
 0x552   :  { %630 = vrot.lane.b32.xlu0 %v2497_v15, %s3044_s4  ;;  %s3068_s4 = smov 72  }
 0x55a   :  { %702 = vrot.lane.b32.xlu0 %v2497_v15, %s3045_s30  ;;  %s3066_s30 = smov 104  }
 0x564   :  { %v517_v55 = vpop.permute.xlu2 %516 }
 0x56c   :  { %v371_v56 = vpop.permute.xlu2 %370 }
 0x56d   :  { %374 = vst.msk [vmem:[#allocation2] sm:$0xff] %vm373_vm12, %v371_v56 }
 0x57d   :  { %v765_v61 = vpop.xlane.xlu0 %764 }
 0x57e   :  { %v766_v62 = vsub.f32 %v762_v36, %v765_v61 }
 0x580   :  { %v767_v63 = vmul.f32 1.442695, %v766_v62  ;;  %v2643_v62 = vld [vmem:[%s3015_s10] ss:$0 sm:$0xff] }
 0x582   :  { %2175 = vpow2.f32 %v767_v63 }
 0x588   :  { %v2176_v0 = vpop.eup %2175 }
 0x589   :  { %v769_v1 = vsel %vm236_vm11, %v2176_v0, 0.0 }
 0x58a   :  { %770 = vadd.xlane.f32.xlu2 %v769_v1  ;;  %v2648_v1 = vld [vmem:[%s3016_s11] ss:$0 sm:$0xff] }
 0x593   :  { %v444_v2 = vpop.permute.xlu1 %443 }
 0x594   :  { %447 = vst.msk [vmem:[#allocation2] sm:$0xff] %vm446_vm13, %v444_v2 }
 0x595   :  { %520 = vst.msk [vmem:[#allocation2] sm:$0xff] %vm519_vm14, %v517_v55 }
 0x59c   :  { %v805_v3 = vld [vmem:[#allocation2] sm:$0xff] }
 0x59d   :  { %2038 = vmatmul.msk.f32.vlgmr.msrb.gmra.mxu2 %vm130_vm3, %v805_v3 }
 0x5a2   :  { %562 = vrot.lane.b32.xlu2 %v2497_v15, %s2286_s2 }
 0x5a9   :  { %v693_v4 = vpop.xlane.xlu0 %692 }
 0x5aa   :  { %v694_v8 = vsub.f32 %v690_v48, %v693_v4 }
 0x5ac   :  { %v695_v11 = vmul.f32 1.442695, %v694_v8  ;;  %v964_v8 = vld [vmem:[%s3019_s14 + $0x38] sm:$0xff] }
 0x5ad   :  { %983 = vmatpush.msra.mxu1 %v964_v8 }
 0x5ae   :  { %v553_v6 = vpop.xlane.xlu2 %552 }
 0x5af   :  { %v554_v7 = vsub.f32 %v550_v51, %v553_v6  ;;  %v903_v51 = vld [vmem:[%s3017_s12 + $0x8] sm:$0xff] }
 0x5b1   :  { %v555_v9 = vmul.f32 1.442695, %v554_v7  ;;  %v627_v12 = vpop.xlane.xlu0 %626 }
 0x5b3   :  { %2177 = vpow2.f32 %v555_v9  ;;  %v963_v9 = vld [vmem:[%s3019_s14 + $0x30] sm:$0xff] }
 0x5b4   :  { %2179 = vpow2.f32 %v695_v11  ;;  %984 = vmatpush.msra.mxu1 %v963_v9  ;;  %v962_v11 = vld [vmem:[%s3019_s14 + $0x28] sm:$0xff] }
 0x5b5   :  { %2181 = vrcp.f32 %v627_v12  ;;  %v961_v12 = vld [vmem:[%s3019_s14 + $0x20] sm:$0xff] }
 0x5b6   :  { %985 = vmatpush.msra.mxu1 %v962_v11 }
 0x5b8   :  { %986 = vmatpush.msra.mxu1 %v961_v12 }
 0x5b9   :  { %v2178_v14 = vpop.eup %2177 }
 0x5ba   :  { %v557_v16 = vsel %vm236_vm11, %v2178_v14, 0.0  ;;  %v2180_v17 = vpop.eup %2179 }
 0x5bb   :  { %558 = vadd.xlane.f32.xlu1 %v557_v16  ;;  %v2182_v18 = vpop.eup %2181  ;;  %v697_v19 = vsel %vm236_vm11, %v2180_v17, 0.0  ;;  %v959_v16 = vld [vmem:[%s3019_s14 + $0x10] sm:$0xff] }
 0x5bc   :  { %v629_v20 = vmul.f32 %v2182_v18, %v2174_v52  ;;  %v902_v52 = vld [vmem:[%s3017_s12] sm:$0xff] }
 0x5bd   :  { %v957_v18 = vld [vmem:[%s3019_s14] sm:$0xff] }
 0x5c3   :  { %698 = vadd.xlane.f32.xlu1 %v697_v19  ;;  %v2683_v19 = vld [vmem:[%s3018_s13] ss:$0 sm:$0xff] }
 0x5c4   :  { %v631_v21 = vpop.permute.xlu0 %630 }
 0x5c5   :  { %651 = vmatpush.msrb.mxu3 %v631_v21 }
 0x5c6   :  { %2031 = vmatmul.msk.f32.vlgmr.msrb.gmra.mxu3 %vm236_vm11, %v629_v20 }
 0x5cc   :  { %v703_v24 = vpop.permute.xlu0 %702 }
 0x5dc   :  { %774 = vrot.lane.b32.xlu1 %v2497_v15, %s2285_s6 }
 0x5fd   :  { %v771_v22 = vpop.xlane.xlu2 %770 }
 0x605   :  { %v563_v23 = vpop.permute.xlu2 %562 }
 0x606   :  { %583 = vmatpush.msra.mxu0 %v563_v23 }
 0x608   :  { %723 = vmatpush.msrb.mxu0 %v703_v24 }
 0x620   :  { %v838_v26 = vpop.f32.mrf.mxu2 }
 0x621   :  { %v839_v27 = vadd.f32 %v2612_v25, %v838_v26 }
 0x623   :  { %v844_v28 = vadd.f32 %v839_v27, %v2472_v5 }
 0x625   :  { %v848_v29 = vsel %vm130_vm3, %v844_v28, 0.0 }
 0x626   :  { %849 = vadd.xlane.f32.xlu0 %v848_v29 }
 0x62e   :  { %v559_v31 = vpop.xlane.xlu1 %558 }
 0x62f   :  { %2183 = vrcp.f32 %v559_v31 }
 0x635   :  { %v2184_v15 = vpop.eup %2183 }
 0x636   :  { %v561_v33 = vmul.f32 %v2184_v15, %v2178_v14  ;;  %v699_v34 = vpop.xlane.xlu1 %698  ;;  %v960_v14 = vld [vmem:[%s3019_s14 + $0x18] sm:$0xff] }
 0x637   :  { %2185 = vrcp.f32 %v699_v34  ;;  %987 = vmatpush.msra.mxu1 %v960_v14  ;;  %v2721_v14 = vld [vmem:[%s3021_s16] ss:$0 sm:$0xff] }
 0x638   :  { %2028 = vmatmul.msk.f32.vlgmr.msra.gmra.mxu0 %vm236_vm11, %v561_v33  ;;  %2187 = vrcp.f32 %v771_v22 }
 0x639   :  { %928 = vmatpush.msra.mxu0 %v905_v49  ;;  %988 = vmatpush.msra.mxu1 %v959_v16 }
 0x63b   :  { %929 = vmatpush.msra.mxu0 %v904_v50 }
 0x63d   :  { %v2186_v35 = vpop.eup %2185  ;;  %930 = vmatpush.msra.mxu0 %v903_v51 }
 0x63e   :  { %v701_v36 = vmul.f32 %v2186_v35, %v2180_v17  ;;  %v2188_v5 = vpop.eup %2187  ;;  %v958_v17 = vld [vmem:[%s3019_s14 + $0x8] sm:$0xff] }
 0x63f   :  { %v773_v38 = vmul.f32 %v2188_v5, %v2176_v0  ;;  %931 = vmatpush.msra.mxu0 %v902_v52  ;;  %989 = vmatpush.msra.mxu1 %v958_v17 }
 0x640   :  { %2034 = vmatmul.msk.f32.vlgmr.msrb.gmra.mxu0 %vm236_vm11, %v701_v36 }
 0x641   :  { %990 = vmatpush.msra.mxu1 %v957_v18  ;;  %v2726_v18 = vld [vmem:[%s3022_s17] ss:$0 sm:$0xff] }
 0x649   :  { %v653_v37 = vpop.f32.mrf.mxu3 }
 0x64a   :  { %657 = vrot.lane.b32.xlu1 %v653_v37, %s2288_s25  ;;  %v2693_v37 = vld [vmem:[%s3020_s15] ss:$0 sm:$0xff] }
 0x64e   :  { %v775_v39 = vpop.permute.xlu1 %774 }
 0x64f   :  { %795 = vmatpush.msra.mxu3 %v775_v39 }
 0x650   :  { %2037 = vmatmul.msk.f32.vlgmr.msra.gmra.mxu3 %vm236_vm11, %v773_v38 }
 0x699   :  { %v850_v40 = vpop.xlane.xlu0 %849 }
 0x69a   :  { %v854_v41 = vmul.f32 %v850_v40, %v2446_v32 }
 0x69c   :  { %v856_v42 = vsub.f32 %v844_v28, %v854_v41 }
 0x69e   :  { %v858_v43 = vmul.f32 %v856_v42, %v856_v42 }
 0x6a0   :  { %v860_v44 = vsel %vm130_vm3, %v858_v43, 0.0 }
 0x6a1   :  { %861 = vadd.xlane.f32.xlu2 %v860_v44 }
 0x6b5   :  { %v585_v45 = vpop.f32.mrf.mxu0 }
 0x6b6   :  { %588 = vst.msk [vmem:[#allocation2 + $0x8] sm:$0xff] %vm236_vm11, %v585_v45 }
 0x6bc   :  { %v658_v46 = vpop.permute.xlu1 %657 }
 0x6bd   :  { %660 = vst.msk [vmem:[#allocation2 + $0x8] sm:$0xff] %vm373_vm12, %v658_v46  ;;  %v725_v47 = vpop.f32.mrf.mxu0 }
 0x6be   :  { %729 = vrot.lane.b32.xlu1 %v725_v47, %s3049_s26  ;;  %s3072_s26 = smov 56  }
 0x6d3   :  { %v797_v48 = vpop.f32.mrf.mxu3 }
 0x6d4   :  { %801 = vrot.lane.b32.xlu1 %v797_v48, %s3047_s1  ;;  %s3070_s1 = smov 112  }
 0x714   :  { %v862_v53 = vpop.xlane.xlu2 %861 }
 0x715   :  { %v866_v54 = vmul.f32 %v862_v53, %v2446_v32 }
 0x717   :  { %v868_v55 = vadd.f32 1e-12, %v866_v54 }
 0x719   :  { %2189 = vrsqrt.f32 %v868_v55  ;;  %vm876_vm1 = vweird.f32 %v868_v55 }
 0x71f   :  { %v2190_v56 = vpop.eup %2189 }
 0x720   :  { %v871_v57 = vmul.f32 %v2190_v56, %v868_v55  ;;  %vm877_vm15 = vweird.f32 %v2190_v56 }
 0x721   :  { %vm878_vm2 = vmor %vm876_vm1, %vm877_vm15 }
 0x722   :  { %v872_v58 = vmul.f32 %v2190_v56, %v871_v57 }
 0x724   :  { %v873_v59 = vmul.f32 0.5, %v872_v58 }
 0x726   :  { %v874_v60 = vsub.f32 1.5, %v873_v59 }
 0x728   :  { %v875_v61 = vmul.f32 %v2190_v56, %v874_v60 }
 0x72a   :  { %v879_v63 = vsel %vm878_vm2, %v2190_v56, %v875_v61 }
 0x72b   :  { %v890_v0 = vmul.f32 %v879_v63, %v856_v42  ;;  %v2047_v63 = vld [vmem:[%s3061_s27 + $0x38] sm:$0xff] }
 0x72c   :  { %1084 = vmatpush.msrb.mxu3 %v2047_v63 }
 0x72d   :  { %v895_v2 = vmul.f32 %v2643_v62, %v890_v0  ;;  %v2046_v0 = vld [vmem:[%s3061_s27 + $0x30] sm:$0xff] }
 0x72e   :  { %1085 = vmatpush.msrb.mxu3 %v2046_v0 }
 0x72f   :  { %v900_v3 = vadd.f32 %v2648_v1, %v895_v2  ;;  %v2045_v2 = vld [vmem:[%s3061_s27 + $0x28] sm:$0xff] }
 0x730   :  { %v730_v4 = vpop.permute.xlu1 %729  ;;  %1086 = vmatpush.msrb.mxu3 %v2045_v2 }
 0x731   :  { %732 = vst.msk [vmem:[#allocation2 + $0x8] sm:$0xff] %vm446_vm13, %v730_v4  ;;  %2040 = vmatmul.msk.f32.vlgmr.msra.gmra.mxu0 %vm130_vm3, %v900_v3 }
 0x746   :  { %v802_v6 = vpop.permute.xlu1 %801 }
 0x747   :  { %804 = vst.msk [vmem:[#allocation2 + $0x8] sm:$0xff] %vm519_vm14, %v802_v6 }
 0x74e   :  { %v806_v7 = vld [vmem:[#allocation2 + $0x8] sm:$0xff] }
 0x74f   :  { %2039 = vmatmul.msk.f32.gmra.mxu2 %vm130_vm3, %v806_v7 }
 0x7ae   :  { %v933_v20 = vpop.f32.mrf.mxu0 }
 0x7af   :  { %v934_v21 = vadd.f32 %v2683_v19, %v933_v20 }
 0x7b1   :  { %v941_v22 = vmul.f32 0.044715, %v934_v21  ;;  %v939_v29 = vmul.f32 0.5, %v934_v21 }
 0x7b3   :  { %v943_v23 = vmul.f32 %v941_v22, %v934_v21 }
 0x7b5   :  { %v945_v24 = vmul.f32 %v943_v23, %v934_v21 }
 0x7b7   :  { %v947_v26 = vadd.f32 %v945_v24, %v934_v21 }
 0x7b9   :  { %v949_v27 = vmul.f32 0.7978846, %v947_v26 }
 0x7bb   :  { %2191 = vtanh.f32 %v949_v27 }
 0x7c1   :  { %v2192_v28 = vpop.eup %2191 }
 0x7c2   :  { %v953_v31 = vadd.f32 1.0, %v2192_v28 }
 0x7c4   :  { %v955_v15 = vmul.f32 %v953_v31, %v939_v29 }
 0x7c6   :  { %2042 = vmatmul.msk.f32.vlgmr.msra.gmra.mxu1 %vm98_vm0, %v955_v15 }
 0x7d2   :  { %v841_v33 = vpop.f32.mrf.mxu2 }
 0x7d3   :  { %v842_v34 = vadd.f32 %v2612_v25, %v841_v33 }
 0x7d5   :  { %v845_v35 = vadd.f32 %v842_v34, %v2476_v10 }
 0x7d7   :  { %v851_v36 = vsel %vm130_vm3, %v845_v35, 0.0 }
 0x7d8   :  { %852 = vadd.xlane.f32.xlu1 %v851_v36 }
 0x843   :  { %v992_v5 = vpop.f32.mrf.mxu1 }
 0x844   :  { %v993_v38 = vadd.f32 %v2693_v37, %v992_v5 }
 0x846   :  { %v998_v39 = vadd.f32 %v993_v38, %v900_v3 }
 0x848   :  { %v1002_v40 = vsel %vm130_vm3, %v998_v39, 0.0 }
 0x849   :  { %1003 = vadd.xlane.f32.xlu0 %v1002_v40 }
 0x84b   :  { %v853_v41 = vpop.xlane.xlu1 %852 }
 0x84c   :  { %v855_v25 = vmul.f32 %v853_v41, %v2446_v32 }
 0x84e   :  { %v857_v42 = vsub.f32 %v845_v35, %v855_v25  ;;  %v2739_v35 = vld [vmem:[%s3012_s7 + $0x1] ss:$0 sm:$0xff]  ;;  %s3067_s7 = smov 120  }
 0x850   :  { %v859_v10 = vmul.f32 %v857_v42, %v857_v42 }
 0x852   :  { %v863_v43 = vsel %vm130_vm3, %v859_v10, 0.0 }
 0x853   :  { %864 = vadd.xlane.f32.xlu2 %v863_v43 }
 0x8bc   :  { %v1004_v44 = vpop.xlane.xlu0 %1003 }
 0x8bd   :  { %v1008_v45 = vmul.f32 %v1004_v44, %v2446_v32 }
 0x8bf   :  { %v1010_v46 = vsub.f32 %v998_v39, %v1008_v45 }
 0x8c1   :  { %v1012_v47 = vmul.f32 %v1010_v46, %v1010_v46 }
 0x8c3   :  { %v1014_v48 = vsel %vm130_vm3, %v1012_v47, 0.0 }
 0x8c4   :  { %1015 = vadd.xlane.f32.xlu2 %v1014_v48 }
 0x8c6   :  { %v865_v49 = vpop.xlane.xlu2 %864 }
 0x8c7   :  { %v867_v50 = vmul.f32 %v865_v49, %v2446_v32 }
 0x8c9   :  { %v869_v51 = vadd.f32 1e-12, %v867_v50 }
 0x8cb   :  { %2193 = vrsqrt.f32 %v869_v51  ;;  %vm886_vm5 = vweird.f32 %v869_v51 }
 0x8d1   :  { %v2194_v52 = vpop.eup %2193 }
 0x8d2   :  { %v881_v53 = vmul.f32 %v2194_v52, %v869_v51  ;;  %vm887_vm4 = vweird.f32 %v2194_v52 }
 0x8d3   :  { %vm888_vm6 = vmor %vm886_vm5, %vm887_vm4 }
 0x8d4   :  { %v882_v54 = vmul.f32 %v2194_v52, %v881_v53 }
 0x8d6   :  { %v883_v55 = vmul.f32 0.5, %v882_v54 }
 0x8d8   :  { %v884_v56 = vsub.f32 1.5, %v883_v55 }
 0x8da   :  { %v885_v57 = vmul.f32 %v2194_v52, %v884_v56 }
 0x8dc   :  { %v889_v58 = vsel %vm888_vm6, %v2194_v52, %v885_v57 }
 0x8dd   :  { %v891_v59 = vmul.f32 %v889_v58, %v857_v42 }
 0x8df   :  { %v896_v60 = vmul.f32 %v2643_v62, %v891_v59  ;;  %v2044_v62 = vld [vmem:[%s3061_s27 + $0x20] sm:$0xff] }
 0x8e0   :  { %1087 = vmatpush.msrb.mxu3 %v2044_v62 }
 0x8e1   :  { %v901_v61 = vadd.f32 %v2648_v1, %v896_v60 }
 0x8e3   :  { %2041 = vmatmul.msk.f32.gmra.mxu0 %vm130_vm3, %v901_v61 }
 0x937   :  { %v1016_v1 = vpop.xlane.xlu2 %1015 }
 0x938   :  { %v1020_v3 = vmul.f32 %v1016_v1, %v2446_v32 }
 0x93a   :  { %v1022_v4 = vadd.f32 1e-12, %v1020_v3 }
 0x93c   :  { %2195 = vrsqrt.f32 %v1022_v4  ;;  %vm1030_vm8 = vweird.f32 %v1022_v4 }
 0x942   :  { %v2196_v6 = vpop.eup %2195 }
 0x943   :  { %v1025_v7 = vmul.f32 %v2196_v6, %v1022_v4  ;;  %vm1031_vm7 = vweird.f32 %v2196_v6 }
 0x944   :  { %vm1032_vm9 = vmor %vm1030_vm8, %vm1031_vm7 }
 0x945   :  { %v1026_v8 = vmul.f32 %v2196_v6, %v1025_v7 }
 0x947   :  { %v1027_v9 = vmul.f32 0.5, %v1026_v8 }
 0x949   :  { %v1028_v11 = vsub.f32 1.5, %v1027_v9 }
 0x94b   :  { %v1029_v12 = vmul.f32 %v2196_v6, %v1028_v11 }
 0x94d   :  { %v1033_v16 = vsel %vm1032_vm9, %v2196_v6, %v1029_v12 }
 0x94e   :  { %v1044_v17 = vmul.f32 %v1033_v16, %v1010_v46 }
 0x950   :  { %v1049_v20 = vmul.f32 %v2721_v14, %v1044_v17 }
 0x952   :  { %v2730_v21 = vadd.f32 %v2726_v18, %v1049_v20 }
 0x954   :  { %2049 = vmatmul.msk.f32.vlgmr.msrb.gmra.mxu3 %vm130_vm3, %v2730_v21 }
 0x960   :  { %v936_v22 = vpop.f32.mrf.mxu0 }
 0x961   :  { %v937_v23 = vadd.f32 %v2683_v19, %v936_v22 }
 0x963   :  { %v942_v24 = vmul.f32 0.044715, %v937_v23  ;;  %v940_v15 = vmul.f32 0.5, %v937_v23 }
 0x965   :  { %v944_v26 = vmul.f32 %v942_v24, %v937_v23 }
 0x967   :  { %v946_v27 = vmul.f32 %v944_v26, %v937_v23 }
 0x969   :  { %v948_v28 = vadd.f32 %v946_v27, %v937_v23 }
 0x96b   :  { %v950_v29 = vmul.f32 0.7978846, %v948_v28 }
 0x96d   :  { %2197 = vtanh.f32 %v950_v29 }
 0x973   :  { %v2198_v31 = vpop.eup %2197 }
 0x974   :  { %v954_v33 = vadd.f32 1.0, %v2198_v31 }
 0x976   :  { %v956_v34 = vmul.f32 %v954_v33, %v940_v15 }
 0x978   :  { %2043 = vmatmul.msk.f32.gmra.mxu1 %vm98_vm0, %v956_v34 }
 0x9d7   :  { %v1089_v36 = vpop.f32.mrf.mxu3 }
 0x9d8   :  { %v2742_v19 = vadd.f32 %v2739_v35, %v1089_v36 }
 0x9da   :  { %1164 = vrot.lane.b32.xlu1 %v2742_v19, %s2278_s29  ;;  %1096 = vrot.lane.b32.xlu2 %v2742_v19, %s3065_s28 }
 0x9e2   :  { %1306 = vrot.lane.b32.xlu1 %v2742_v19, %s3066_s30 }
 0x9f5   :  { %v995_v5 = vpop.f32.mrf.mxu1 }
 0x9f6   :  { %v996_v38 = vadd.f32 %v2693_v37, %v995_v5 }
 0x9f8   :  { %v999_v39 = vadd.f32 %v996_v38, %v901_v61 }
 0x9fa   :  { %v1005_v40 = vsel %vm130_vm3, %v999_v39, 0.0 }
 0x9fb   :  { %1006 = vadd.xlane.f32.xlu0 %v1005_v40 }
 0xa34   :  { %v1097_v41 = vpop.permute.xlu2 %1096 }
 0xa35   :  { %2051 = vmatpush.xpose.msk.msra.mxu2 %vm236_vm11, %v1097_v41 }
 0xa38   :  { %2052 = vmatmul.msk.f32.vlgmr.msra.gmra.mxu2 %vm236_vm11, %v2742_v19 }
 0xa4c   :  { %v1165_v25 = vpop.permute.xlu1 %1164 }
 0xa4d   :  { %2054 = vmatpush.xpose.msk.msra.mxu3 %vm236_vm11, %v1165_v25 }
 0xa54   :  { %v1307_v6 = vpop.permute.xlu1 %1306 }
 0xa6e   :  { %v1007_v42 = vpop.xlane.xlu0 %1006 }
 0xa6f   :  { %v1009_v10 = vmul.f32 %v1007_v42, %v2446_v32 }
 0xa71   :  { %v1011_v43 = vsub.f32 %v999_v39, %v1009_v10 }
 0xa73   :  { %v1013_v44 = vmul.f32 %v1011_v43, %v1011_v43 }
 0xa75   :  { %v1017_v37 = vsel %vm130_vm3, %v1013_v44, 0.0 }
 0xa76   :  { %1018 = vadd.xlane.f32.xlu0 %v1017_v37 }
 0xabb   :  { %v1119_v45 = vpop.f32.mrf.mxu2 }
 0xabc   :  { %v1122_v46 = vmul.f32 0.35355338, %v1119_v45 }
 0xabe   :  { %v1123_v47 = vadd.f32 %v1122_v46, %v2524_v30 }
 0xac0   :  { %v1124_v48 = vsel %vm236_vm11, %v1123_v47, -inf }
 0xac1   :  { %1125 = vmax.xlane.f32.xlu0 %v1124_v48 }
 0xad5   :  { %1162 = vrot.lane.b32.xlu0 %v2742_v19, %s3067_s7 }
 0xadd   :  { %1308 = vrot.lane.b32.xlu0 %v2742_v19, %s3068_s4 }
 0xae5   :  { %1135 = vrot.lane.b32.xlu0 %v2742_v19, %s2286_s2 }
 0xae9   :  { %v1019_v49 = vpop.xlane.xlu0 %1018 }
 0xaea   :  { %v1021_v50 = vmul.f32 %v1019_v49, %v2446_v32 }
 0xaec   :  { %v1023_v51 = vadd.f32 1e-12, %v1021_v50 }
 0xaed   :  { %1236 = vrot.lane.b32.xlu0 %v2742_v19, %s3069_s0 }
 0xaee   :  { %2199 = vrsqrt.f32 %v1023_v51  ;;  %vm1040_vm15 = vweird.f32 %v1023_v51 }
 0xaf4   :  { %v2200_v52 = vpop.eup %2199 }
 0xaf5   :  { %v1035_v53 = vmul.f32 %v2200_v52, %v1023_v51  ;;  %1234 = vrot.lane.b32.xlu0 %v2742_v19, %s3070_s1  ;;  %vm1041_vm10 = vweird.f32 %v2200_v52 }
 0xaf6   :  { %vm1042_vm1 = vmor %vm1040_vm15, %vm1041_vm10  ;;  %vm1925_vm10 = vcmask 1040384   ;;  %vm1990_vm15 = vcmask 9216  }
 0xaf7   :  { %v1036_v54 = vmul.f32 %v2200_v52, %v1035_v53 }
 0xaf9   :  { %v1037_v55 = vmul.f32 0.5, %v1036_v54 }
 0xafb   :  { %v1038_v56 = vsub.f32 1.5, %v1037_v55 }
 0xafd   :  { %v1039_v57 = vmul.f32 %v2200_v52, %v1038_v56 }
 0xaff   :  { %v1043_v58 = vsel %vm1042_vm1, %v2200_v52, %v1039_v57 }
 0xb00   :  { %v1045_v59 = vmul.f32 %v1043_v58, %v1011_v43 }
 0xb02   :  { %v1050_v60 = vmul.f32 %v2721_v14, %v1045_v59 }
 0xb04   :  { %v2773_v61 = vadd.f32 %v2726_v18, %v1050_v60 }
 0xb06   :  { %2050 = vmatmul.msk.f32.gmra.mxu3 %vm130_vm3, %v2773_v61 }
 0xb34   :  { %v1126_v63 = vpop.xlane.xlu0 %1125 }
 0xb35   :  { %v1127_v0 = vsub.f32 %v1123_v47, %v1126_v63 }
 0xb37   :  { %v1128_v2 = vmul.f32 1.442695, %v1127_v0 }
 0xb39   :  { %2201 = vpow2.f32 %v1128_v2 }
 0xb3f   :  { %v2202_v62 = vpop.eup %2201 }
 0xb40   :  { %v1130_v1 = vsel %vm236_vm11, %v2202_v62, 0.0 }
 0xb41   :  { %1131 = vadd.xlane.f32.xlu2 %v1130_v1 }
 0xb47   :  { %v1163_v3 = vpop.permute.xlu0 %1162 }
 0xb48   :  { %2055 = vmatmul.msk.f32.vlgmr.msra.gmra.mxu3 %vm236_vm11, %v1163_v3 }
 0xb4f   :  { %v1309_v4 = vpop.permute.xlu0 %1308 }
 0xb50   :  { %2060 = vmatpush.xpose.msk.msrb.mxu3 %vm236_vm11, %v1309_v4 }
 0xb53   :  { %2061 = vmatmul.msk.f32.vlgmr.msrb.gmra.mxu3 %vm236_vm11, %v1307_v6 }
 0xb57   :  { %v1136_v7 = vpop.permute.xlu0 %1135 }
 0xb58   :  { %1156 = vmatpush.msrb.mxu0 %v1136_v7 }
 0xb5f   :  { %v1237_v8 = vpop.permute.xlu0 %1236 }
 0xb60   :  { %2057 = vmatpush.xpose.msk.msra.mxu0 %vm236_vm11, %v1237_v8 }
 0xb67   :  { %v1235_v17 = vpop.permute.xlu0 %1234 }
 0xb89   :  { %v1092_v9 = vpop.f32.mrf.mxu3 }
 0xb8a   :  { %v2783_v11 = vadd.f32 %v2739_v35, %v1092_v9 }
 0xb8c   :  { %1447 = vrot.lane.b32.xlu1 %v2783_v11, %s2278_s29  ;;  %1589 = vrot.lane.b32.xlu0 %v2783_v11, %s3066_s30  ;;  %s3071_s29 = smov 48  }
 0xb8d   :  { %1379 = vrot.lane.b32.xlu2 %v2783_v11, %s3065_s28 }
 0xb94   :  { %1445 = vrot.lane.b32.xlu1 %v2783_v11, %s3067_s7  ;;  %1517 = vrot.lane.b32.xlu0 %v2783_v11, %s3070_s1 }
 0xb9c   :  { %1591 = vrot.lane.b32.xlu1 %v2783_v11, %s3068_s4 }
 0xba4   :  { %1519 = vrot.lane.b32.xlu1 %v2783_v11, %s3069_s0 }
 0xbb4   :  { %v1132_v12 = vpop.xlane.xlu2 %1131 }
 0xbb5   :  { %2203 = vrcp.f32 %v1132_v12 }
 0xbbb   :  { %v2204_v14 = vpop.eup %2203 }
 0xbbc   :  { %v1134_v16 = vmul.f32 %v2204_v14, %v2202_v62  ;;  %v2126_v62 = vpack.i.bf16 %v2783_v11, %v2742_v19 }
 0xbbe   :  { %2053 = vmatmul.msk.f32.vlgmr.msrb.gmra.mxu0 %vm236_vm11, %v1134_v16 }
 0xbc6   :  { %2058 = vmatmul.msk.f32.vlgmr.msra.gmra.mxu0 %vm236_vm11, %v1235_v17 }
 0xbcb   :  { %v1187_v18 = vpop.f32.mrf.mxu3 }
 0xbcc   :  { %v1190_v20 = vmul.f32 0.35355338, %v1187_v18 }
 0xbce   :  { %v1191_v22 = vadd.f32 %v1190_v20, %v2524_v30 }
 0xbd0   :  { %v1192_v23 = vsel %vm236_vm11, %v1191_v22, -inf }
 0xbd1   :  { %1193 = vmax.xlane.f32.xlu1 %v1192_v23 }
 0xbd6   :  { %v1331_v24 = vpop.f32.mrf.mxu3 }
 0xbd7   :  { %v1334_v26 = vmul.f32 0.35355338, %v1331_v24 }
 0xbd9   :  { %v1335_v27 = vadd.f32 %v1334_v26, %v2524_v30 }
 0xbdb   :  { %v1336_v28 = vsel %vm236_vm11, %v1335_v27, -inf }
 0xbdc   :  { %1337 = vmax.xlane.f32.xlu0 %v1336_v28 }
 0xbe7   :  { %v1380_v29 = vpop.permute.xlu2 %1379 }
 0xbe8   :  { %2063 = vmatpush.xpose.msk.msrb.mxu0 %vm236_vm11, %v1380_v29 }
 0xbeb   :  { %2064 = vmatmul.msk.f32.vlgmr.msrb.gmra.mxu0 %vm236_vm11, %v2783_v11 }
 0xbfe   :  { %v1448_v31 = vpop.permute.xlu1 %1447  ;;  %v1590_v34 = vpop.permute.xlu0 %1589 }
 0xbff   :  { %2066 = vmatpush.xpose.msk.msra.mxu3 %vm236_vm11, %v1448_v31 }
 0xc06   :  { %v1446_v15 = vpop.permute.xlu1 %1445  ;;  %v1518_v36 = vpop.permute.xlu0 %1517 }
 0xc07   :  { %2067 = vmatmul.msk.f32.vlgmr.msra.gmra.mxu3 %vm236_vm11, %v1446_v15 }
 0xc0e   :  { %v1592_v33 = vpop.permute.xlu1 %1591 }
 0xc0f   :  { %2072 = vmatpush.xpose.msk.msrb.mxu3 %vm236_vm11, %v1592_v33 }
 0xc12   :  { %2073 = vmatmul.msk.f32.vlgmr.msrb.gmra.mxu3 %vm236_vm11, %v1590_v34 }
 0xc16   :  { %v1520_v35 = vpop.permute.xlu1 %1519 }
 0xc17   :  { %2069 = vmatpush.xpose.msk.msra.mxu0 %vm236_vm11, %v1520_v35 }
 0xc1a   :  { %2070 = vmatmul.msk.f32.vlgmr.msra.gmra.mxu0 %vm236_vm11, %v1518_v36 }
 0xc3b   :  { %v1158_v5 = vpop.f32.mrf.mxu0 }
 0xc3c   :  { %1161 = vst.msk [vmem:[#allocation2] sm:$0xff] %vm236_vm11, %v1158_v5 }
 0xc43   :  { %v1259_v44 = vpop.f32.mrf.mxu0 }
 0xc44   :  { %v1194_v38 = vpop.xlane.xlu1 %1193  ;;  %v1262_v45 = vmul.f32 0.35355338, %v1259_v44 }
 0xc45   :  { %v1195_v39 = vsub.f32 %v1191_v22, %v1194_v38 }
 0xc46   :  { %v1263_v47 = vadd.f32 %v1262_v45, %v2524_v30 }
 0xc47   :  { %v1196_v40 = vmul.f32 1.442695, %v1195_v39 }
 0xc48   :  { %v1264_v48 = vsel %vm236_vm11, %v1263_v47, -inf }
 0xc49   :  { %2205 = vpow2.f32 %v1196_v40 }
 0xc4f   :  { %v2815_v41 = vpop.eup %2205  ;;  %v1338_v25 = vpop.xlane.xlu0 %1337 }
 0xc50   :  { %v1339_v42 = vsub.f32 %v1335_v27, %v1338_v25  ;;  %v1198_v10 = vsel %vm236_vm11, %v2815_v41, 0.0 }
 0xc51   :  { %1199 = vadd.xlane.f32.xlu0 %v1198_v10 }
 0xc52   :  { %v1340_v43 = vmul.f32 1.442695, %v1339_v42 }
 0xc54   :  { %2207 = vpow2.f32 %v1340_v43 }
 0xc5a   :  { %v2819_v37 = vpop.eup %2207 }
 0xc5b   :  { %v1342_v46 = vsel %vm236_vm11, %v2819_v37, 0.0 }
 0xc5c   :  { %1343 = vadd.xlane.f32.xlu2 %v1342_v46 }
 0xc64   :  { %1265 = vmax.xlane.f32.xlu2 %v1264_v48 }
 0xc68   :  { %v1402_v49 = vpop.f32.mrf.mxu0 }
 0xc69   :  { %v1405_v50 = vmul.f32 0.35355338, %v1402_v49 }
 0xc6b   :  { %v1406_v51 = vadd.f32 %v1405_v50, %v2560_v13 }
 0xc6d   :  { %v1407_v52 = vsel %vm236_vm11, %v1406_v51, -inf }
 0xc6e   :  { %1408 = vmax.xlane.f32.xlu0 %v1407_v52 }
 0xc8a   :  { %v1470_v53 = vpop.f32.mrf.mxu3 }
 0xc8b   :  { %v1473_v54 = vmul.f32 0.35355338, %v1470_v53 }
 0xc8d   :  { %v1474_v55 = vadd.f32 %v1473_v54, %v2560_v13 }
 0xc8f   :  { %v1475_v56 = vsel %vm236_vm11, %v1474_v55, -inf }
 0xc90   :  { %1476 = vmax.xlane.f32.xlu1 %v1475_v56 }
 0xc95   :  { %v1614_v57 = vpop.f32.mrf.mxu3 }
 0xc96   :  { %v1617_v58 = vmul.f32 0.35355338, %v1614_v57 }
 0xc97   :  { %v1542_v30 = vpop.f32.mrf.mxu0 }
 0xc98   :  { %v1545_v59 = vmul.f32 0.35355338, %v1542_v30  ;;  %v1618_v60 = vadd.f32 %v1617_v58, %v2560_v13 }
 0xc9a   :  { %v1619_v63 = vsel %vm236_vm11, %v1618_v60, -inf  ;;  %v1546_v0 = vadd.f32 %v1545_v59, %v2560_v13 }
 0xc9b   :  { %1620 = vmax.xlane.f32.xlu2 %v1619_v63 }
 0xc9c   :  { %v1547_v2 = vsel %vm236_vm11, %v1546_v0, -inf }
 0xc9d   :  { %1548 = vmax.xlane.f32.xlu1 %v1547_v2 }
 0xcb3   :  { %1275 = vrot.lane.b32.xlu2 %v2742_v19, %s3071_s29 }
 0xcb6   :  { %2127 = vrot.lane.b32.xlu1 %v2126_v62, %s3072_s26 }
 0xcc4   :  { %v1200_v8 = vpop.xlane.xlu0 %1199 }
 0xccf   :  { %v1344_v1 = vpop.xlane.xlu2 %1343 }
 0xcd7   :  { %v1266_v3 = vpop.xlane.xlu2 %1265 }
 0xcd8   :  { %v1267_v4 = vsub.f32 %v1263_v47, %v1266_v3 }
 0xcda   :  { %v1268_v6 = vmul.f32 1.442695, %v1267_v4  ;;  %v2078_v4 = vld [vmem:[%s3013_s8 + $0x38] sm:$0xff] }
 0xcdb   :  { %1691 = vmatpush.msrb.mxu0 %v2078_v4  ;;  %v2096_v4 = vld [vmem:[%s3019_s14 + $0x68] sm:$0xff] }
 0xcdc   :  { %2209 = vpow2.f32 %v1268_v6  ;;  %v2077_v6 = vld [vmem:[%s3013_s8 + $0x30] sm:$0xff] }
 0xcdd   :  { %1692 = vmatpush.msrb.mxu0 %v2077_v6  ;;  %v2095_v6 = vld [vmem:[%s3019_s14 + $0x60] sm:$0xff] }
 0xce1   :  { %v1409_v9 = vpop.xlane.xlu0 %1408 }
 0xce2   :  { %v2210_v7 = vpop.eup %2209  ;;  %v1410_v16 = vsub.f32 %v1406_v51, %v1409_v9 }
 0xce3   :  { %v1270_v13 = vsel %vm236_vm11, %v2210_v7, 0.0 }
 0xce4   :  { %1271 = vadd.xlane.f32.xlu0 %v1270_v13  ;;  %v1411_v18 = vmul.f32 1.442695, %v1410_v16  ;;  %v2075_v13 = vld [vmem:[%s3013_s8 + $0x20] sm:$0xff] }
 0xcf8   :  { %1347 = vrot.lane.b32.xlu0 %v2742_v19, %s2285_s6 }
 0xd03   :  { %v1477_v12 = vpop.xlane.xlu1 %1476 }
 0xd04   :  { %v1478_v14 = vsub.f32 %v1474_v55, %v1477_v12 }
 0xd06   :  { %v1479_v17 = vmul.f32 1.442695, %v1478_v14 }
 0xd08   :  { %2211 = vpow2.f32 %v1479_v17 }
 0xd09   :  { %2213 = vpow2.f32 %v1411_v18  ;;  %v2142_v18 = vld [vmem:[%s3014_s9 + $0x1] ss:$0 sm:$0xff] }
 0xd0e   :  { %v2212_v20 = vpop.eup %2211  ;;  %v1621_v22 = vpop.xlane.xlu2 %1620 }
 0xd0f   :  { %v1622_v23 = vsub.f32 %v1618_v60, %v1621_v22  ;;  %v1481_v24 = vsel %vm236_vm11, %v2212_v20, 0.0  ;;  %v2214_v19 = vpop.eup %2213 }
 0xd10   :  { %v1549_v26 = vpop.xlane.xlu1 %1548  ;;  %1482 = vadd.xlane.f32.xlu2 %v1481_v24  ;;  %v1413_v15 = vsel %vm236_vm11, %v2214_v19, 0.0 }
 0xd11   :  { %v1623_v27 = vmul.f32 1.442695, %v1622_v23  ;;  %v1550_v28 = vsub.f32 %v1546_v0, %v1549_v26 }
 0xd13   :  { %2215 = vpow2.f32 %v1623_v27  ;;  %v1551_v29 = vmul.f32 1.442695, %v1550_v28 }
 0xd15   :  { %2217 = vpow2.f32 %v1551_v29 }
 0xd16   :  { %v1276_v31 = vpop.permute.xlu2 %1275  ;;  %2219 = vrcp.f32 %v1200_v8 }
 0xd17   :  { %1296 = vmatpush.msrb.mxu1 %v1276_v31 }
 0xd18   :  { %1414 = vadd.xlane.f32.xlu2 %v1413_v15 }
 0xd19   :  { %v2216_v33 = vpop.eup %2215 }
 0xd1a   :  { %v1625_v34 = vsel %vm236_vm11, %v2216_v33, 0.0 }
 0xd1b   :  { %1626 = vadd.xlane.f32.xlu1 %v1625_v34  ;;  %v2218_v35 = vpop.eup %2217 }
 0xd1c   :  { %v1553_v36 = vsel %vm236_vm11, %v2218_v35, 0.0  ;;  %v2220_v5 = vpop.eup %2219 }
 0xd1d   :  { %v1202_v40 = vmul.f32 %v2220_v5, %v2815_v41 }
 0xd22   :  { %1554 = vadd.xlane.f32.xlu0 %v1553_v36 }
 0xd28   :  { %v2128_v38 = vpop.permute.xlu1 %2127 }
 0xd29   :  { %v2129_v39 = vunpack.i.l.bf16 %v2128_v38  ;;  %v2130_v45 = vunpack.i.h.bf16 %v2128_v38 }
 0xd2b   :  { %1224 = vmatpush.msrb.mxu2 %v2129_v39  ;;  %v2086_v39 = vld [vmem:[%s3017_s12 + $0x30] sm:$0xff] }
 0xd2c   :  { %2056 = vmatmul.msk.f32.vlgmr.msrb.gmra.mxu2 %vm236_vm11, %v1202_v40  ;;  %v2085_v40 = vld [vmem:[%s3017_s12 + $0x28] sm:$0xff] }
 0xd30   :  { %1418 = vrot.lane.b32.xlu2 %v2783_v11, %s2286_s2  ;;  %s3074_s2 = smov 24  }
 0xd38   :  { %1630 = vrot.lane.b32.xlu2 %v2783_v11, %s2285_s6  ;;  %s3073_s6 = smov 16  }
 0xd40   :  { %1558 = vrot.lane.b32.xlu2 %v2783_v11, %s3071_s29 }
 0xd57   :  { %v1272_v25 = vpop.xlane.xlu0 %1271 }
 0xd58   :  { %2221 = vrcp.f32 %v1272_v25  ;;  %v2084_v25 = vld [vmem:[%s3017_s12 + $0x20] sm:$0xff] }
 0xd59   :  { %2223 = vrcp.f32 %v1344_v1 }
 0xd5e   :  { %v2222_v42 = vpop.eup %2221 }
 0xd5f   :  { %v1274_v10 = vmul.f32 %v2222_v42, %v2210_v7  ;;  %v2224_v41 = vpop.eup %2223  ;;  %v2076_v7 = vld [vmem:[%s3013_s8 + $0x28] sm:$0xff] }
 0xd60   :  { %v1346_v43 = vmul.f32 %v2224_v41, %v2819_v37  ;;  %1693 = vmatpush.msrb.mxu0 %v2076_v7  ;;  %v2094_v7 = vld [vmem:[%s3019_s14 + $0x58] sm:$0xff] }
 0xd61   :  { %2059 = vmatmul.msk.f32.vlgmr.msrb.gmra.mxu1 %vm236_vm11, %v1274_v10 }
 0xd62   :  { %1694 = vmatpush.msrb.mxu0 %v2075_v13  ;;  %v2093_v13 = vld [vmem:[%s3019_s14 + $0x50] sm:$0xff] }
 0xd6a   :  { %v1348_v44 = vpop.permute.xlu0 %1347 }
 0xd6b   :  { %1368 = vmatpush.msra.mxu2 %v1348_v44 }
 0xd6c   :  { %2062 = vmatmul.msk.f32.vlgmr.msra.gmra.mxu2 %vm236_vm11, %v1346_v43 }
 0xd6d   :  { %1507 = vmatpush.msrb.mxu2 %v2130_v45 }
 0xd83   :  { %v1483_v46 = vpop.xlane.xlu2 %1482 }
 0xd84   :  { %2225 = vrcp.f32 %v1483_v46 }
 0xd8a   :  { %v2226_v47 = vpop.eup %2225 }
 0xd8b   :  { %v1485_v11 = vmul.f32 %v2226_v47, %v2212_v20  ;;  %v1415_v48 = vpop.xlane.xlu2 %1414 }
 0xd8c   :  { %2227 = vrcp.f32 %v1415_v48  ;;  %v2143_v48 = vld [vmem:[%s3015_s10 + $0x1] ss:$0 sm:$0xff] }
 0xd8d   :  { %2068 = vmatmul.msk.f32.vlgmr.msrb.gmra.mxu2 %vm236_vm11, %v1485_v11 }
 0xd8e   :  { %v1627_v49 = vpop.xlane.xlu1 %1626 }
 0xd8f   :  { %2229 = vrcp.f32 %v1627_v49 }
 0xd92   :  { %v2228_v50 = vpop.eup %2227 }
 0xd93   :  { %v1417_v51 = vmul.f32 %v2228_v50, %v2214_v19  ;;  %v1419_v52 = vpop.permute.xlu2 %1418 }
 0xd94   :  { %1439 = vmatpush.msra.mxu1 %v1419_v52 }
 0xd95   :  { %2065 = vmatmul.msk.f32.vlgmr.msra.gmra.mxu1 %vm236_vm11, %v1417_v51  ;;  %v1555_v37 = vpop.xlane.xlu0 %1554  ;;  %v2230_v53 = vpop.eup %2229  ;;  %v2144_v51 = vld [vmem:[%s3016_s11 + $0x1] ss:$0 sm:$0xff] }
 0xd96   :  { %2231 = vrcp.f32 %v1555_v37  ;;  %v1629_v54 = vmul.f32 %v2230_v53, %v2216_v33 }
 0xd9b   :  { %v1631_v55 = vpop.permute.xlu2 %1630 }
 0xd9c   :  { %1651 = vmatpush.msra.mxu2 %v1631_v55  ;;  %v2232_v56 = vpop.eup %2231 }
 0xd9d   :  { %2074 = vmatmul.msk.f32.vlgmr.msra.gmra.mxu2 %vm236_vm11, %v1629_v54  ;;  %v1557_v57 = vmul.f32 %v2232_v56, %v2218_v35 }
 0xda3   :  { %v1559_v58 = vpop.permute.xlu2 %1558 }
 0xda4   :  { %1579 = vmatpush.msrb.mxu1 %v1559_v58 }
 0xda5   :  { %2071 = vmatmul.msk.f32.vlgmr.msrb.gmra.mxu1 %vm236_vm11, %v1557_v57 }
 0xdaf   :  { %v1226_v30 = vpop.f32.mrf.mxu2 }
 0xdb0   :  { %1230 = vrot.lane.b32.xlu1 %v1226_v30, %s2288_s25 }
 0xdde   :  { %v1298_v59 = vpop.f32.mrf.mxu1 }
 0xddf   :  { %1302 = vrot.lane.b32.xlu2 %v1298_v59, %s3073_s6 }
 0xdef   :  { %v1370_v60 = vpop.f32.mrf.mxu2 }
 0xdf0   :  { %1374 = vrot.lane.b32.xlu0 %v1370_v60, %s3074_s2 }
 0xe10   :  { %v1509_v63 = vpop.f32.mrf.mxu2 }
 0xe11   :  { %1513 = vrot.lane.b32.xlu2 %v1509_v63, %s2288_s25 }
 0xe12   :  { %v1441_v0 = vpop.f32.mrf.mxu1 }
 0xe13   :  { %1444 = vst.msk [vmem:[#allocation2 + $0x8] sm:$0xff] %vm236_vm11, %v1441_v0 }
 0xe20   :  { %v1653_v2 = vpop.f32.mrf.mxu2 }
 0xe21   :  { %1657 = vrot.lane.b32.xlu1 %v1653_v2, %s3074_s2 }
 0xe22   :  { %v1231_v62 = vpop.permute.xlu1 %1230  ;;  %v1581_v1 = vpop.f32.mrf.mxu1 }
 0xe23   :  { %1233 = vst.msk [vmem:[#allocation2] sm:$0xff] %vm373_vm12, %v1231_v62  ;;  %1585 = vrot.lane.b32.xlu2 %v1581_v1, %s3073_s6  ;;  %v2098_v1 = vld [vmem:[%s3019_s14 + $0x78] sm:$0xff] }
 0xe24   :  { %1847 = vmatpush.msra.mxu3 %v2098_v1 }
 0xe39   :  { %v1303_v3 = vpop.permute.xlu2 %1302 }
 0xe3a   :  { %1305 = vst.msk [vmem:[#allocation2] sm:$0xff] %vm446_vm13, %v1303_v3  ;;  %v2097_v3 = vld [vmem:[%s3019_s14 + $0x70] sm:$0xff] }
 0xe3b   :  { %1848 = vmatpush.msra.mxu3 %v2097_v3 }
 0xe3d   :  { %1849 = vmatpush.msra.mxu3 %v2096_v4 }
 0xe3f   :  { %1850 = vmatpush.msra.mxu3 %v2095_v6 }
 0xe41   :  { %1851 = vmatpush.msra.mxu3 %v2094_v7 }
 0xe43   :  { %1852 = vmatpush.msra.mxu3 %v2093_v13 }
 0xe62   :  { %v1375_v8 = vpop.permute.xlu0 %1374 }
 0xe63   :  { %1377 = vst.msk [vmem:[#allocation2] sm:$0xff] %vm519_vm14, %v1375_v8  ;;  %v2092_v8 = vld [vmem:[%s3019_s14 + $0x48] sm:$0xff] }
 0xe64   :  { %1853 = vmatpush.msra.mxu3 %v2092_v8 }
 0xe6a   :  { %v1661_v9 = vld [vmem:[#allocation2] sm:$0xff] }
 0xe6b   :  { %2080 = vmatmul.msk.f32.vlgmr.msrb.gmra.mxu0 %vm130_vm3, %v1661_v9  ;;  %v1514_v12 = vpop.permute.xlu2 %1513  ;;  %v2091_v9 = vld [vmem:[%s3019_s14 + $0x40] sm:$0xff] }
 0xe6c   :  { %1516 = vst.msk [vmem:[#allocation2 + $0x8] sm:$0xff] %vm373_vm12, %v1514_v12  ;;  %1854 = vmatpush.msra.mxu3 %v2091_v9  ;;  %v2145_v12 = vld [vmem:[%s3018_s13 + $0x1] ss:$0 sm:$0xff]  ;;  %s1997_s13 = sshll.u32 %s2290_s23, 4  ;;  %s1998_s13 = int_to_ptr.vmem [resolvable:$true] %s1997_s13 }
 0xe7d   :  { %v1586_v14 = vpop.permute.xlu2 %1585 }
 0xe7e   :  { %1588 = vst.msk [vmem:[#allocation2 + $0x8] sm:$0xff] %vm446_vm13, %v1586_v14 }
 0xe93   :  { %v1658_v16 = vpop.permute.xlu1 %1657 }
 0xe94   :  { %1660 = vst.msk [vmem:[#allocation2 + $0x8] sm:$0xff] %vm519_vm14, %v1658_v16 }
 0xe9b   :  { %v1662_v17 = vld [vmem:[#allocation2 + $0x8] sm:$0xff] }
 0xe9c   :  { %2081 = vmatmul.msk.f32.gmra.mxu0 %vm130_vm3, %v1662_v17 }
 0xee8   :  { %v1696_v20 = vpop.f32.mrf.mxu0 }
 0xee9   :  { %v1697_v22 = vadd.f32 %v2142_v18, %v1696_v20 }
 0xeeb   :  { %v1702_v23 = vadd.f32 %v1697_v22, %v2730_v21 }
 0xeed   :  { %v1708_v24 = vsel %vm130_vm3, %v1702_v23, 0.0 }
 0xeee   :  { %1709 = vadd.xlane.f32.xlu0 %v1708_v24 }
 0xf19   :  { %v1699_v26 = vpop.f32.mrf.mxu0 }
 0xf1a   :  { %v1700_v27 = vadd.f32 %v2142_v18, %v1699_v26 }
 0xf1c   :  { %v1703_v28 = vadd.f32 %v1700_v27, %v2773_v61  ;;  %v2087_v61 = vld [vmem:[%s3017_s12 + $0x38] sm:$0xff] }
 0xf1d   :  { %1790 = vmatpush.msra.mxu1 %v2087_v61  ;;  %v2146_v61 = vld [vmem:[%s3020_s15 + $0x1] ss:$0 sm:$0xff]  ;;  %s1999_s15 = sshll.u32 %s3027_s22, 4  ;;  %s2000_s15 = int_to_ptr.hbm [resolvable:$true] %s1999_s15 }
 0xf1e   :  { %v1711_v19 = vsel %vm130_vm3, %v1703_v28, 0.0 }
 0xf1f   :  { %1712 = vadd.xlane.f32.xlu2 %v1711_v19  ;;  %1791 = vmatpush.msra.mxu1 %v2086_v39 }
 0xf21   :  { %1792 = vmatpush.msra.mxu1 %v2085_v40 }
 0xf23   :  { %1793 = vmatpush.msra.mxu1 %v2084_v25 }
 0xf61   :  { %v1710_v29 = vpop.xlane.xlu0 %1709 }
 0xf62   :  { %v1714_v31 = vmul.f32 %v1710_v29, %v2446_v32 }
 0xf64   :  { %v1716_v15 = vsub.f32 %v1702_v23, %v1714_v31 }
 0xf66   :  { %v1718_v33 = vmul.f32 %v1716_v15, %v1716_v15 }
 0xf68   :  { %v1720_v34 = vsel %vm130_vm3, %v1718_v33, 0.0 }
 0xf69   :  { %1721 = vadd.xlane.f32.xlu1 %v1720_v34 }
 0xf92   :  { %v1713_v35 = vpop.xlane.xlu2 %1712 }
 0xf93   :  { %v1715_v21 = vmul.f32 %v1713_v35, %v2446_v32 }
 0xf95   :  { %v1717_v36 = vsub.f32 %v1703_v28, %v1715_v21 }
 0xf97   :  { %v1719_v5 = vmul.f32 %v1717_v36, %v1717_v36 }
 0xf99   :  { %v1723_v38 = vsel %vm130_vm3, %v1719_v5, 0.0 }
 0xf9a   :  { %1724 = vadd.xlane.f32.xlu0 %v1723_v38 }
 0xfdc   :  { %v1722_v42 = vpop.xlane.xlu1 %1721 }
 0xfdd   :  { %v1726_v10 = vmul.f32 %v1722_v42, %v2446_v32 }
 0xfdf   :  { %v1728_v41 = vadd.f32 1e-12, %v1726_v10 }
 0xfe1   :  { %2233 = vrsqrt.f32 %v1728_v41  ;;  %vm1736_vm12 = vweird.f32 %v1728_v41 }
 0xfe7   :  { %v2234_v43 = vpop.eup %2233 }
 0xfe8   :  { %v1731_v44 = vmul.f32 %v2234_v43, %v1728_v41  ;;  %vm1737_vm11 = vweird.f32 %v2234_v43 }
 0xfe9   :  { %vm1738_vm13 = vmor %vm1736_vm12, %vm1737_vm11 }
 0xfea   :  { %v1732_v45 = vmul.f32 %v2234_v43, %v1731_v44 }
 0xfec   :  { %v1733_v46 = vmul.f32 0.5, %v1732_v45 }
 0xfee   :  { %v1734_v47 = vsub.f32 1.5, %v1733_v46 }
 0xff0   :  { %v1735_v11 = vmul.f32 %v2234_v43, %v1734_v47 }
 0xff2   :  { %v1739_v49 = vsel %vm1738_vm13, %v2234_v43, %v1735_v11 }
 0xff3   :  { %v1750_v50 = vmul.f32 %v1739_v49, %v1716_v15 }
 0xff5   :  { %v1755_v52 = vmul.f32 %v2143_v48, %v1750_v50 }
 0xff7   :  { %v2917_v37 = vadd.f32 %v2144_v51, %v1755_v52 }
 0xff9   :  { %2089 = vmatmul.msk.f32.vlgmr.msra.gmra.mxu1 %vm130_vm3, %v2917_v37 }
0x100d   :  { %v1725_v53 = vpop.xlane.xlu0 %1724 }
0x100e   :  { %v1727_v54 = vmul.f32 %v1725_v53, %v2446_v32 }
0x1010   :  { %v1729_v55 = vadd.f32 1e-12, %v1727_v54 }
0x1012   :  { %2235 = vrsqrt.f32 %v1729_v55  ;;  %vm1746_vm2 = vweird.f32 %v1729_v55 }
0x1018   :  { %v2236_v56 = vpop.eup %2235 }
0x1019   :  { %v1741_v57 = vmul.f32 %v2236_v56, %v1729_v55  ;;  %vm1747_vm14 = vweird.f32 %v2236_v56 }
0x101a   :  { %vm1748_vm4 = vmor %vm1746_vm2, %vm1747_vm14 }
0x101b   :  { %v1742_v58 = vmul.f32 %v2236_v56, %v1741_v57  ;;  %v1929_v57 = vld [vmem:[%s3023_s18 + $0x10] sm:$0xff] }
0x101d   :  { %v1743_v30 = vmul.f32 0.5, %v1742_v58 }
0x101f   :  { %v1744_v59 = vsub.f32 1.5, %v1743_v30  ;;  %v1928_v30 = vld [vmem:[%s3023_s18 + $0x8] sm:$0xff] }
0x1021   :  { %v1745_v60 = vmul.f32 %v2236_v56, %v1744_v59  ;;  %v1927_v59 = vld [vmem:[%s3023_s18] sm:$0xff] }
0x1023   :  { %v1749_v63 = vsel %vm1748_vm4, %v2236_v56, %v1745_v60  ;;  %v1930_v56 = vld [vmem:[%s3023_s18 + $0x18] sm:$0xff] }
0x1024   :  { %v1751_v0 = vmul.f32 %v1749_v63, %v1717_v36  ;;  %1950 = vmatpush.msrb.mxu2 %v1930_v56 }
0x1026   :  { %v1756_v2 = vmul.f32 %v2143_v48, %v1751_v0  ;;  %1951 = vmatpush.msrb.mxu2 %v1929_v57 }
0x1028   :  { %v1761_v62 = vadd.f32 %v2144_v51, %v1756_v2  ;;  %1952 = vmatpush.msrb.mxu2 %v1928_v30 }
0x102a   :  { %2090 = vmatmul.msk.f32.gmra.mxu1 %vm130_vm3, %v1761_v62  ;;  %1953 = vmatpush.msrb.mxu2 %v1927_v59 }
0x1076   :  { %v1795_v14 = vpop.f32.mrf.mxu1 }
0x1077   :  { %v1796_v16 = vadd.f32 %v2145_v12, %v1795_v14 }
0x1079   :  { %v1803_v17 = vmul.f32 0.044715, %v1796_v16  ;;  %v1801_v26 = vmul.f32 0.5, %v1796_v16 }
0x107b   :  { %v1805_v18 = vmul.f32 %v1803_v17, %v1796_v16 }
0x107d   :  { %v1807_v20 = vmul.f32 %v1805_v18, %v1796_v16 }
0x107f   :  { %v1809_v22 = vadd.f32 %v1807_v20, %v1796_v16 }
0x1081   :  { %v1811_v23 = vmul.f32 0.7978846, %v1809_v22 }
0x1083   :  { %2237 = vtanh.f32 %v1811_v23  ;;  %v2148_v23 = vld [vmem:[%s3022_s17 + $0x1] ss:$0 sm:$0xff] }
0x1089   :  { %v2238_v24 = vpop.eup %2237 }
0x108a   :  { %v1815_v27 = vadd.f32 1.0, %v2238_v24 }
0x108c   :  { %v1817_v28 = vmul.f32 %v1815_v27, %v1801_v26 }
0x108e   :  { %2100 = vmatmul.msk.f32.vlgmr.msra.gmra.mxu3 %vm98_vm0, %v1817_v28 }
0x10a7   :  { %v1798_v19 = vpop.f32.mrf.mxu1 }
0x10a8   :  { %v1799_v29 = vadd.f32 %v2145_v12, %v1798_v19  ;;  %v1962_v19 = vld [vmem:[%s3025_s20 + $0x18] sm:$0xff] }
0x10a9   :  { %1982 = vmatpush.msra.mxu2 %v1962_v19 }
0x10aa   :  { %v1804_v31 = vmul.f32 0.044715, %v1799_v29  ;;  %v1802_v36 = vmul.f32 0.5, %v1799_v29 }
0x10ac   :  { %v1806_v15 = vmul.f32 %v1804_v31, %v1799_v29  ;;  %v1960_v31 = vld [vmem:[%s3025_s20 + $0x8] sm:$0xff] }
0x10ae   :  { %v1808_v33 = vmul.f32 %v1806_v15, %v1799_v29  ;;  %v1959_v15 = vld [vmem:[%s3025_s20] sm:$0xff] }
0x10b0   :  { %v1810_v34 = vadd.f32 %v1808_v33, %v1799_v29  ;;  %v1961_v29 = vld [vmem:[%s3025_s20 + $0x10] sm:$0xff]  ;;  %v2149_v33 = vld [vmem:[%s3024_s19] ss:$0 sm:$0xff] }
0x10b1   :  { %1983 = vmatpush.msra.mxu2 %v1961_v29 }
0x10b2   :  { %v1812_v35 = vmul.f32 0.7978846, %v1810_v34 }
0x10b3   :  { %1984 = vmatpush.msra.mxu2 %v1960_v31 }
0x10b4   :  { %2239 = vtanh.f32 %v1812_v35 }
0x10b5   :  { %1985 = vmatpush.msra.mxu2 %v1959_v15 }
0x10ba   :  { %v2240_v21 = vpop.eup %2239 }
0x10bb   :  { %v1816_v5 = vadd.f32 1.0, %v2240_v21 }
0x10bd   :  { %v1818_v38 = vmul.f32 %v1816_v5, %v1802_v36  ;;  %v2150_v36 = vld [vmem:[%s3026_s21] ss:$0 sm:$0xff] }
0x10bf   :  { %2101 = vmatmul.msk.f32.gmra.mxu3 %vm98_vm0, %v1818_v38 }
0x1111   :  { %v1856_v39 = vpop.f32.mrf.mxu3 }
0x1112   :  { %v1857_v40 = vadd.f32 %v2146_v61, %v1856_v39 }
0x1114   :  { %v1862_v25 = vadd.f32 %v1857_v40, %v2917_v37 }
0x1116   :  { %v1868_v42 = vsel %vm130_vm3, %v1862_v25, 0.0 }
0x1117   :  { %1869 = vadd.xlane.f32.xlu1 %v1868_v42 }
0x1142   :  { %v1859_v10 = vpop.f32.mrf.mxu3 }
0x1143   :  { %v1860_v41 = vadd.f32 %v2146_v61, %v1859_v10 }
0x1145   :  { %v1863_v43 = vadd.f32 %v1860_v41, %v1761_v62 }
0x1147   :  { %v1871_v44 = vsel %vm130_vm3, %v1863_v43, 0.0 }
0x1148   :  { %1872 = vadd.xlane.f32.xlu2 %v1871_v44 }
0x118a   :  { %v1870_v45 = vpop.xlane.xlu1 %1869 }
0x118b   :  { %v1874_v46 = vmul.f32 %v1870_v45, %v2446_v32 }
0x118d   :  { %v1876_v47 = vsub.f32 %v1862_v25, %v1874_v46 }
0x118f   :  { %v1878_v11 = vmul.f32 %v1876_v47, %v1876_v47 }
0x1191   :  { %v1880_v48 = vsel %vm130_vm3, %v1878_v11, 0.0 }
0x1192   :  { %1881 = vadd.xlane.f32.xlu2 %v1880_v48 }
0x11bb   :  { %v1873_v49 = vpop.xlane.xlu2 %1872 }
0x11bc   :  { %v1875_v50 = vmul.f32 %v1873_v49, %v2446_v32 }
0x11be   :  { %v1877_v51 = vsub.f32 %v1863_v43, %v1875_v50 }
0x11c0   :  { %v1879_v52 = vmul.f32 %v1877_v51, %v1877_v51 }
0x11c2   :  { %v1883_v37 = vsel %vm130_vm3, %v1879_v52, 0.0 }
0x11c3   :  { %1884 = vadd.xlane.f32.xlu0 %v1883_v37 }
0x1205   :  { %v1882_v53 = vpop.xlane.xlu2 %1881 }
0x1206   :  { %v1886_v54 = vmul.f32 %v1882_v53, %v2446_v32 }
0x1208   :  { %v1888_v55 = vadd.f32 1e-12, %v1886_v54 }
0x120a   :  { %2241 = vrsqrt.f32 %v1888_v55  ;;  %vm1896_vm5 = vweird.f32 %v1888_v55 }
0x1210   :  { %v2242_v58 = vpop.eup %2241 }
0x1211   :  { %v1891_v60 = vmul.f32 %v2242_v58, %v1888_v55  ;;  %vm1897_vm0 = vweird.f32 %v2242_v58 }
0x1212   :  { %vm1898_vm6 = vmor %vm1896_vm5, %vm1897_vm0 }
0x1213   :  { %v1892_v2 = vmul.f32 %v2242_v58, %v1891_v60 }
0x1215   :  { %v1893_v1 = vmul.f32 0.5, %v1892_v2 }
0x1217   :  { %v1894_v3 = vsub.f32 1.5, %v1893_v1 }
0x1219   :  { %v1895_v7 = vmul.f32 %v2242_v58, %v1894_v3 }
0x121b   :  { %v1899_v9 = vsel %vm1898_vm6, %v2242_v58, %v1895_v7 }
0x121c   :  { %v1910_v16 = vmul.f32 %v1899_v9, %v1876_v47 }
0x1236   :  { %v1885_v63 = vpop.xlane.xlu0 %1884 }
0x1237   :  { %v1887_v0 = vmul.f32 %v1885_v63, %v2446_v32  ;;  %v2147_v32 = vld [vmem:[%s3021_s16 + $0x1] ss:$0 sm:$0xff] }
0x1238   :  { %v1915_v20 = vmul.f32 %v2147_v32, %v1910_v16 }
0x1239   :  { %v1889_v62 = vadd.f32 1e-12, %v1887_v0 }
0x123a   :  { %v1920_v26 = vadd.f32 %v2148_v23, %v1915_v20 }
0x123b   :  { %2243 = vrsqrt.f32 %v1889_v62  ;;  %vm1906_vm8 = vweird.f32 %v1889_v62 }
0x1241   :  { %v2244_v4 = vpop.eup %2243 }
0x1242   :  { %v1901_v6 = vmul.f32 %v2244_v4, %v1889_v62  ;;  %vm1907_vm7 = vweird.f32 %v2244_v4 }
0x1243   :  { %vm1908_vm9 = vmor %vm1906_vm8, %vm1907_vm7 }
0x1244   :  { %v1902_v13 = vmul.f32 %v2244_v4, %v1901_v6 }
0x1246   :  { %v1903_v8 = vmul.f32 0.5, %v1902_v13 }
0x1248   :  { %v1904_v12 = vsub.f32 1.5, %v1903_v8 }
0x124a   :  { %v1905_v14 = vmul.f32 %v2244_v4, %v1904_v12 }
0x124c   :  { %v1909_v17 = vsel %vm1908_vm9, %v2244_v4, %v1905_v14 }
0x124d   :  { %v1911_v18 = vmul.f32 %v1909_v17, %v1877_v51 }
0x124f   :  { %v1916_v22 = vmul.f32 %v2147_v32, %v1911_v18 }
0x1251   :  { %v1921_v24 = vadd.f32 %v2148_v23, %v1916_v22 }
0x1253   :  { %v1923_v27 = vrot.slane %v1921_v24, 7 }
0x1255   :  { %v1926_v28 = vsel %vm1925_vm10, %v1920_v26, %v1923_v27 }
0x1256   :  { %2104 = vmatmul.msk.f32.vlgmr.msrb.gmra.mxu2 %vm130_vm3, %v1926_v28 }
0x12d9   :  { %v1955_v34 = vpop.f32.mrf.mxu2 }
0x12da   :  { %v1956_v35 = vadd.f32 %v2149_v33, %v1955_v34 }
0x12dc   :  { %2245 = vtanh.f32 %v1956_v35 }
0x12e2   :  { %v2246_v21 = vpop.eup %2245 }
0x12e3   :  { %2105 = vmatmul.msk.f32.vlgmr.msra.gmra.mxu2 %vm130_vm3, %v2246_v21 }
0x1366   :  { %v1987_v5 = vpop.f32.mrf.mxu2 }
0x1367   :  { %v1988_v38 = vadd.f32 %v2150_v36, %v1987_v5 }
0x1369   :  { %1991 = vst.msk [vmem:[#allocation3] sm:$0x3] %vm1990_vm15, %v1988_v38 }
0x136a   :  { %2002 = dma.vmem_to_hbm [thread:$0]  %s1998_s13, 32, %s2000_s15, [#allocation4]  }
0x136b   :  { %2271 = dma.done.wait [#allocation4], 32  }
0x136c   :  { %2272 = vsyncadd [#allocation4], 4294967264 }
0x136d   :  { %2007 = vsyncpa [#allocation4], 1 }

</bundles_post_ra>
